<compile_context>
chip_gen: v7x
topology: tpu7x:2x2x1
jax: 0.10.0
libtpu: 0.0.40
codegen_flags: <defaults>
</compile_context>

<pallas_src>
import functools
from typing import NamedTuple

import numpy as np
import jax
import jax.numpy as jnp
from jax.experimental import pallas as pl
from jax.experimental.pallas import tpu as pltpu


# --------------------------------------------------------------------------
# Fused kernel: streamed CM matmul + online-LSE cross entropy (loss_nce),
# neighbour-consistency losses (loss_ce, loss_KL) fused into the prologue.
# --------------------------------------------------------------------------
def _cm_fused_kernel(x_ref, feat_ref, meta_ref, tgt_ref, l0_ref, l1_ref,
                     pos_ref, d_ref, valid_ref, vkl_ref,
                     lse_ref, tl_ref, aux_ref,
                     xn_sc, m_sc, l_sc, t_sc,
                     *, inv_temp, alpha, inv_temp_dist, tile_n,
                     tiles_per_split, apply_scale, apply_bias, approx_recip):
    c = pl.program_id(0)          # N-stream split (maps to a TensorCore on v7x)
    n = pl.program_id(1)          # tile within this split
    n_last = pl.num_programs(1) - 1
    B = x_ref.shape[0]

    # ------------- prologue (first tile of this split) -------------
    @pl.when(n == 0)
    def _prologue():
        x = x_ref[...]                                            # (B, D) f32
        # F.normalize(x, dim=1) with 1/temp folded in (EUP rsqrt)
        inv_norm = jax.lax.rsqrt(
            jnp.maximum(jnp.sum(x * x, axis=1, keepdims=True), 1e-24))
        xn_sc[...] = (x * (inv_norm * inv_temp)).astype(xn_sc.dtype)
        m_sc[...] = jnp.full(m_sc.shape, -1e30, jnp.float32)
        l_sc[...] = jnp.zeros(l_sc.shape, jnp.float32)
        t_sc[...] = jnp.zeros(t_sc.shape, jnp.float32)

        # Neighbour-consistency losses: independent of the feature stream, so
        # they are computed here (hidden behind the in-flight tile DMAs)
        # instead of sitting in an exposed serial epilogue.
        l0 = l0_ref[...]                                          # (B, C)
        l1 = l1_ref[...]
        tgt = tgt_ref[...]                                        # (B, 1) int32
        C = l0.shape[1]

        def _softmax(z):
            e = jnp.exp(z - jnp.max(z, axis=1, keepdims=True))
            s = jnp.sum(e, axis=1, keepdims=True)
            if approx_recip:
                return e * pl.reciprocal(s, approx=True)          # EUP rcp
            return e / s

        def _logsoftmax(z):
            mz = jnp.max(z, axis=1, keepdims=True)
            return z - mz - jnp.log(jnp.sum(jnp.exp(z - mz), axis=1,
                                            keepdims=True))

        sm0, sm1 = _softmax(l0), _softmax(l1)
        lsm0, lsm1 = _logsoftmax(l0), _logsoftmax(l1)

        d = d_ref[...] * inv_temp_dist                            # (B, K)
        valid = valid_ref[...]
        vkl = vkl_ref[...]
        pos = pos_ref[...]                                        # (B, K) int32
        K = pos.shape[1]

        # max-stabilised softmax over the (duplicated) valid-neighbour
        # distances: each valid neighbour contributes two entries (views 0/1)
        # with the same distance -> weight = exp(d/t) / (2 * sum exp(d/t)).
        any_valid = jnp.sum(valid, axis=1, keepdims=True) > 0.0
        dmax = jnp.max(jnp.where(valid > 0.0, d, -1e30), axis=1, keepdims=True)
        dmax = jnp.where(any_valid, dmax, 0.0)
        w = valid * jnp.exp(d - dmax)
        S = jnp.sum(w, axis=1, keepdims=True)
        wn = w * jnp.where(any_valid, 0.5 / jnp.maximum(S, 1e-30), 0.0)

        cnt = jnp.sum(vkl, axis=1, keepdims=True)
        wkl = vkl * jnp.where(cnt > 0.0, 1.0 / jnp.maximum(cnt, 1e-30), 0.0)

        # scatter per-slot weights into (B, B) batch-row aggregation matrices
        # (K is a small static constant; for B >= ~128 switch this to a
        # lax.fori_loop over k to bound vreg live ranges).
        jcol = jax.lax.broadcasted_iota(jnp.int32, (B, B), 1)
        a_w = jnp.zeros((B, B), jnp.float32)
        a_kl = jnp.zeros((B, B), jnp.float32)
        for k in range(K):
            hit = (jcol == pos[:, k:k + 1]).astype(jnp.float32)   # (B, B)
            a_w = a_w + hit * wn[:, k:k + 1]
            a_kl = a_kl + hit * wkl[:, k:k + 1]

        ln1 = jax.lax.dot_general(a_w, sm0 + sm1, (((1,), (0,)), ((), ())),
                                  preferred_element_type=jnp.float32)
        ln1_kl = jax.lax.dot_general(a_kl, sm0, (((1,), (0,)), ((), ())),
                                     preferred_element_type=jnp.float32)

        # refined targets + cross entropy (loss_ce)
        ccol = jax.lax.broadcasted_iota(jnp.int32, (B, C), 1)
        onehot_t = (ccol == tgt).astype(jnp.float32)
        refined = alpha * onehot_t + (1.0 - alpha) * ln1
        ce_m = jnp.sum(jnp.sum(-refined * lsm0, axis=1, keepdims=True),
                       axis=0, keepdims=True) * (1.0 / B)         # (1, 1)

        # KLDivLoss(log_softmax(l1), ln1_kl), reduction='batchmean'
        tlogt = jnp.where(ln1_kl > 0.0,
                          ln1_kl * jnp.log(jnp.maximum(ln1_kl, 1e-30)), 0.0)
        kl_m = jnp.sum(jnp.sum(tlogt - ln1_kl * lsm1, axis=1, keepdims=True),
                       axis=0, keepdims=True) * (1.0 / B)         # (1, 1)

        # pack both aux losses into one lane-padded (1, 128) output block
        lane = jax.lax.broadcasted_iota(jnp.int32, (1, 128), 1)
        aux = jnp.where(lane == 0, ce_m, jnp.where(lane == 1, kl_m, 0.0))
        aux_ref[...] = aux[None]

    # ------------- every tile: (B,D) x (tile_n,D)^T on the MXU -------------
    feat = feat_ref[...]                                          # (tile_n, D)
    if feat.dtype != xn_sc.dtype:
        feat = feat.astype(xn_sc.dtype)                           # int8/fp8 -> bf16
    logits = jax.lax.dot_general(
        xn_sc[...], feat, (((1,), (1,)), ((), ())),
        preferred_element_type=jnp.float32)                       # (B, tile_n)
    if apply_scale:                                               # dequant scale
        logits = logits * meta_ref[0:1, :]
    if apply_bias:                                                # N-padding mask
        logits = logits + meta_ref[1:2, :]

    # online LSE update
    m_prev = m_sc[...]
    m_new = jnp.maximum(m_prev, jnp.max(logits, axis=1, keepdims=True))
    l_sc[...] = (l_sc[...] * jnp.exp(m_prev - m_new)
                 + jnp.sum(jnp.exp(logits - m_new), axis=1, keepdims=True))
    m_sc[...] = m_new

    # gather the target-column logit of this tile
    col = jax.lax.broadcasted_iota(jnp.int32, logits.shape, 1)
    tgt_local = tgt_ref[...] - (c * tiles_per_split + n) * tile_n
    t_sc[...] += jnp.sum(jnp.where(col == tgt_local, logits, 0.0),
                         axis=1, keepdims=True)

    # ------------- finalize (last tile of this split) -------------
    @pl.when(n == n_last)
    def _finalize():
        lse = m_sc[...] + jnp.log(l_sc[...])                      # (B, 1)
        lse_ref[...] = lse[None]                                  # (1, B, 1)
        tl_ref[...] = t_sc[...][None]


# --------------------------------------------------------------------------
# Tile sizing / VMEM budgeting per chip generation
# --------------------------------------------------------------------------
def _vmem_capacity_bytes():
    try:
        return int(pltpu.get_tpu_info().vmem_capacity_bytes)
    except Exception:
        return 64 * 1024 * 1024            # conservative (v7x-sized) fallback


def _choose_tile_n(n_slots, d, itemsize, max_tile_n=None):
    """Largest lane-aligned feature tile whose double buffer fits the chip."""
    cap = _vmem_capacity_bytes()
    # generous per-buffer budget on 128 MiB parts (v5e/v6e), tight on v7x
    per_buf = cap // 4 if cap >= (96 << 20) else cap // 8
    per_buf = int(min(max(per_buf, 2 << 20), 32 << 20))
    tile = per_buf // max(d * itemsize, 1)
    tile = int(min(max(tile, 128), 8192))
    tile = (tile // 128) * 128
    if max_tile_n is not None:
        tile = min(tile, max(128, (int(max_tile_n) // 128) * 128))
    if n_slots <= tile:
        return int(n_slots)                # single tile == full array
    return int(tile)


def _quant_info(feature_dtype):
    dt = jnp.dtype(feature_dtype)
    if dt == jnp.dtype(jnp.int8):
        return True, 127.0
    if dt.itemsize == 1:                   # fp8 flavours (v7x)
        return True, float(jnp.finfo(dt).max)
    return False, 1.0


class PreparedBank(NamedTuple):
    data: jax.Array       # (padded_n, D) native layout, quantised / cast
    colmeta: jax.Array    # (2, padded_n) f32: row0 = dequant scale, row1 = pad bias
    n_total: int
    tile_n: int
    num_splits: int
    quantized: bool


def prepare_feature_bank(features, *, feature_dtype=jnp.bfloat16,
                         max_tile_n=None, num_splits=None):
    """One-time bank preparation (quantise/cast + pad, native (N, D) layout).

    Call this once per memory-bank update and reuse the result across forward
    calls: it removes the per-call cast/transpose/pad HBM round trip.
    """
    N, D = features.shape
    itemsize = jnp.dtype(feature_dtype).itemsize
    tile_n = _choose_tile_n(N, D, itemsize, max_tile_n)
    total_tiles = -(-N // tile_n)
    if num_splits is None:
        num_splits = 2 if total_tiles >= 2 else 1     # both TCs on v7x
    num_splits = max(1, min(int(num_splits), total_tiles))
    tiles_per_split = -(-total_tiles // num_splits)
    padded_n = num_splits * tiles_per_split * tile_n

    f = features.astype(jnp.float32)
    quantized, qmax = _quant_info(feature_dtype)
    if quantized:
        amax = jnp.maximum(jnp.max(jnp.abs(f), axis=1, keepdims=True), 1e-12)
        scaled = f * (qmax / amax)
        if jnp.dtype(feature_dtype) == jnp.dtype(jnp.int8):
            data = jnp.clip(jnp.round(scaled), -qmax, qmax).astype(jnp.int8)
        else:
            data = scaled.astype(feature_dtype)
        col_scale = (amax[:, 0] * (1.0 / qmax)).astype(jnp.float32)
    else:
        data = f.astype(feature_dtype)
        col_scale = jnp.ones((N,), jnp.float32)

    if padded_n != N:
        data = jnp.pad(data, ((0, padded_n - N), (0, 0)))
        col_scale = jnp.pad(col_scale, (0, padded_n - N), constant_values=1.0)
    pad_bias = jnp.where(jnp.arange(padded_n) < N, 0.0, -1e30).astype(jnp.float32)
    colmeta = jnp.stack([col_scale, pad_bias], axis=0)            # (2, padded_n)
    return PreparedBank(data, colmeta, int(N), int(tile_n), int(num_splits),
                        bool(quantized))


# --------------------------------------------------------------------------
# Wrapper (glue: neighbour membership lookup + pallas_call plumbing)
# --------------------------------------------------------------------------
def cluster_memory_forward(inputs, inputs_logits, targets, indexes, neighbors,
                           neighbor_dists, rampup, features, *, temp, alpha,
                           temp_dist, lambda1, lambda2, eps_consistency,
                           feature_dtype=jnp.bfloat16, approx_recip=True,
                           max_tile_n=None, num_splits=None):
    x = inputs[0].astype(jnp.float32)
    l0 = inputs_logits[0].astype(jnp.float32)
    l1 = inputs_logits[1].astype(jnp.float32)
    B, D = x.shape
    C = l0.shape[1]
    K = neighbors.shape[1]

    if isinstance(features, PreparedBank):
        bank = features
    else:
        # NOTE: prefer preparing once (per bank update) and persisting; doing
        # it here costs an extra full bank read+write every call.
        bank = prepare_feature_bank(features, feature_dtype=feature_dtype,
                                    max_tile_n=max_tile_n,
                                    num_splits=num_splits)

    N = bank.n_total
    padded_n = bank.data.shape[0]
    tile_n = bank.tile_n
    num_splits_ = bank.num_splits
    tiles_per_split = padded_n // (num_splits_ * tile_n)
    apply_scale = bool(bank.quantized)
    apply_bias = padded_n != N

    feat_itemsize = jnp.dtype(bank.data.dtype).itemsize
    compute_dtype = jnp.float32 if feat_itemsize >= 4 else jnp.bfloat16

    tgt2 = targets.astype(jnp.int32).reshape(B, 1)

    # Glue: torch builds idx2bidx (python dict) and filters neighbours with
    # `nb in indexes`; here that becomes a membership mask + argmax lookup
    # (tiny, done once in XLA before the kernel), kept lane-dense as (B, K).
    match = neighbors[:, :, None] == indexes[None, None, :]        # (B, K, B)
    valid = jnp.any(match, axis=-1)
    pos = jnp.argmax(match, axis=-1).astype(jnp.int32)             # (B, K)
    validkl = valid & (neighbor_dists <= eps_consistency)

    d_bk = neighbor_dists.astype(jnp.float32)
    valid_bk = valid.astype(jnp.float32)
    vkl_bk = validkl.astype(jnp.float32)

    kernel = functools.partial(
        _cm_fused_kernel,
        inv_temp=float(1.0 / temp), alpha=float(alpha),
        inv_temp_dist=float(1.0 / temp_dist), tile_n=int(tile_n),
        tiles_per_split=int(tiles_per_split),
        apply_scale=apply_scale, apply_bias=apply_bias,
        approx_recip=bool(approx_recip))

    resident = lambda c, n: (0, 0)            # small operands stay put in VMEM
    grid_spec = pltpu.PrefetchScalarGridSpec(
        num_scalar_prefetch=0,
        grid=(num_splits_, tiles_per_split),
        in_specs=[
            pl.BlockSpec((B, D), resident),                       # inputs[0]
            pl.BlockSpec((tile_n, D),                             # feature tiles
                         lambda c, n: (c * tiles_per_split + n, 0)),
            pl.BlockSpec((2, tile_n),                             # scale + pad bias
                         lambda c, n: (0, c * tiles_per_split + n)),
            pl.BlockSpec((B, 1), resident),                       # targets
            pl.BlockSpec((B, C), resident),                       # logits view 0
            pl.BlockSpec((B, C), resident),                       # logits view 1
            pl.BlockSpec((B, K), resident),                       # neighbour batch row
            pl.BlockSpec((B, K), resident),                       # neighbour distances
            pl.BlockSpec((B, K), resident),                       # valid mask
            pl.BlockSpec((B, K), resident),                       # valid & within-eps
        ],
        out_specs=(
            pl.BlockSpec((1, B, 1), lambda c, n: (c, 0, 0)),      # per-split LSE
            pl.BlockSpec((1, B, 1), lambda c, n: (c, 0, 0)),      # per-split tgt logit
            pl.BlockSpec((1, 1, 128), lambda c, n: (c, 0, 0)),    # packed aux losses
        ),
        scratch_shapes=[
            pltpu.VMEM((B, D), compute_dtype),                    # normalised inputs / temp
            pltpu.VMEM((B, 1), jnp.float32),                      # running max
            pltpu.VMEM((B, 1), jnp.float32),                      # running sum-exp
            pltpu.VMEM((B, 1), jnp.float32),                      # target logit
        ])

    # VMEM budget: streamed double buffer + double-buffered residents + scratch
    stream_buf = tile_n * D * feat_itemsize + 2 * tile_n * 4
    resident_bytes = B * D * 4 + B * 4 + 2 * B * C * 4 + 4 * B * K * 4
    out_bytes = 2 * B * 4 + 128 * 4
    scratch_bytes = B * D * jnp.dtype(compute_dtype).itemsize + 3 * B * 4
    need = (2 * stream_buf + 2 * resident_bytes + 2 * out_bytes
            + scratch_bytes + (4 << 20))
    cap = _vmem_capacity_bytes()
    vmem_limit = int(min(max(need, 32 << 20), int(cap * 0.9)))

    lse_part, tl_part, aux = pl.pallas_call(
        kernel,
        out_shape=(jax.ShapeDtypeStruct((num_splits_, B, 1), jnp.float32),
                   jax.ShapeDtypeStruct((num_splits_, B, 1), jnp.float32),
                   jax.ShapeDtypeStruct((num_splits_, 1, 128), jnp.float32)),
        grid_spec=grid_spec,
        compiler_params=pltpu.CompilerParams(
            dimension_semantics=("parallel", "arbitrary"),
            vmem_limit_bytes=vmem_limit),
    )(x, bank.data, bank.colmeta, tgt2, l0, l1, pos, d_bk, valid_bk, vkl_bk)

    # merge per-split partial LSE / target logits (tiny, plain XLA)
    lse_p = lse_part[:, :, 0]                                     # (S, B)
    mmax = jnp.max(lse_p, axis=0)
    lse = mmax + jnp.log(jnp.sum(jnp.exp(lse_p - mmax[None, :]), axis=0))
    tlog = jnp.sum(tl_part[:, :, 0], axis=0)
    loss_nce = jnp.mean(lse - tlog)

    loss_ce = aux[0, 0, 0]
    loss_kl = aux[0, 0, 1]
    return loss_nce, lambda1 * loss_ce, lambda2 * rampup * loss_kl


# --------------------------------------------------------------------------
# Pure-numpy reference mirroring the torch loops (for validation)
# --------------------------------------------------------------------------
def _forward_ref_numpy(x0, l0, l1, targets, indexes, neighbors, ndists, rampup,
                       features, temp, alpha, temp_dist, lambda1, lambda2, eps):
    x0 = np.asarray(x0, np.float64)
    l0 = np.asarray(l0, np.float64)
    l1 = np.asarray(l1, np.float64)
    features = np.asarray(features, np.float64)
    targets = np.asarray(targets)
    indexes = np.asarray(indexes)
    neighbors = np.asarray(neighbors)
    ndists = np.asarray(ndists, np.float64)
    B, C = l0.shape

    def softmax(z, axis=-1):
        m = z.max(axis=axis, keepdims=True)
        e = np.exp(z - m)
        return e / e.sum(axis=axis, keepdims=True)

    def logsoftmax(z, axis=-1):
        m = z.max(axis=axis, keepdims=True)
        return z - m - np.log(np.exp(z - m).sum(axis=axis, keepdims=True))

    xn = x0 / np.maximum(np.linalg.norm(x0, axis=1, keepdims=True), 1e-12)
    out = xn @ features.T / temp
    lsm = logsoftmax(out, axis=1)
    loss_nce = np.mean(-lsm[np.arange(B), targets])

    onehot = np.zeros_like(l0)
    onehot[np.arange(B), targets] = 1.0
    idx2bidx = {int(v): i for i, v in enumerate(indexes)}
    idxset = set(int(v) for v in indexes)
    ln1, ln1kl = [], []
    for b in range(B):
        feats_, feats_kl, dvalid = [], [], []
        for i in range(neighbors.shape[1]):
            nbv = int(neighbors[b, i])
            if nbv in idxset:
                j = idx2bidx[nbv]
                if ndists[b, i] <= eps:
                    feats_kl.append(l0[j])
                feats_.append(l0[j])
                feats_.append(l1[j])
                dvalid.extend([ndists[b, i], ndists[b, i]])
        w = softmax(np.asarray(dvalid) / temp_dist, axis=0)
        sm = softmax(np.stack(feats_), axis=1)
        ln1.append((sm * w[:, None]).sum(0))
        ln1kl.append(softmax(np.stack(feats_kl), axis=1).mean(0))
    ln1 = np.stack(ln1)
    ln1kl = np.stack(ln1kl)

    refined = alpha * onehot + (1.0 - alpha) * ln1
    loss_ce = np.mean((-refined * logsoftmax(l0, axis=1)).sum(1))
    lsm1 = logsoftmax(l1, axis=1)
    tlogt = np.where(ln1kl > 0, ln1kl * np.log(np.maximum(ln1kl, 1e-300)), 0.0)
    loss_kl = np.sum(tlogt - ln1kl * lsm1) / B
    return (loss_nce, lambda1 * loss_ce, lambda2 * rampup * loss_kl)


# --------------------------------------------------------------------------
if __name__ == "__main__":
    key = jax.random.PRNGKey(0)
    # batch, feat dim, memory slots (= #classes of the logits), neighbours
    B, D, N, K = 8, 32, 200, 4
    C = N
    temp, alpha = 0.05, 0.7
    temp_dist, lambda1, lambda2, eps_consistency = 0.1, 1.0, 0.5, 0.15
    rampup = 0.3

    ks = jax.random.split(key, 8)
    x0 = jax.random.normal(ks[0], (B, D), jnp.float32)
    x1 = jax.random.normal(ks[1], (B, D), jnp.float32)
    l0 = jax.random.normal(ks[2], (B, C), jnp.float32)
    l1 = jax.random.normal(ks[3], (B, C), jnp.float32)
    targets = jax.random.randint(ks[4], (B,), 0, N).astype(jnp.int32)

    # The module registers a zeros (num_samples, num_features) buffer; init it
    # deterministically with L2-normalised rows so the matmul is non-trivial.
    feats = jax.random.normal(ks[5], (N, D), jnp.float32)
    feats = feats / jnp.linalg.norm(feats, axis=1, keepdims=True)

    indexes = jnp.arange(B, dtype=jnp.int32) * 3 + 1       # unique dataset ids
    # neighbours: K-1 real batch members + one id NOT present in `indexes`
    nb = jnp.stack([jnp.roll(indexes, -s) for s in range(K - 1)], axis=1)
    nb = jnp.concatenate([nb, jnp.full((B, 1), 9999, jnp.int32)], axis=1)
    ndist = jax.random.uniform(ks[6], (B, K), jnp.float32, 0.0, 0.3)
    ndist = ndist.at[:, 0].set(0.05)   # guarantee >=1 neighbour within eps/row

    ref = _forward_ref_numpy(x0, l0, l1, targets, indexes, nb, ndist, rampup,
                             feats, temp, alpha, temp_dist, lambda1, lambda2,
                             eps_consistency)

    # 1) bf16 persisted bank, forced small tile -> exercises the 2-way split
    #    (both v7x TCs), multi-tile online LSE and the N-padding bias mask.
    bank_bf16 = prepare_feature_bank(feats, feature_dtype=jnp.bfloat16,
                                     max_tile_n=128, num_splits=2)
    out_fast = cluster_memory_forward(
        (x0, x1), (l0, l1), targets, indexes, nb, ndist, rampup, bank_bf16,
        temp=temp, alpha=alpha, temp_dist=temp_dist, lambda1=lambda1,
        lambda2=lambda2, eps_consistency=eps_consistency)
    out_fast = jax.block_until_ready(out_fast)
    for got, want in zip(out_fast, ref):
        np.testing.assert_allclose(float(got), float(want),
                                   rtol=5e-2, atol=5e-2)

    # 2) int8 quantised bank with per-slot dequant scale (v5e/v6e; fp8 on v7x
    #    uses the same code path) -> halves the streamed HBM bytes.
    bank_i8 = prepare_feature_bank(feats, feature_dtype=jnp.int8,
                                   max_tile_n=128, num_splits=2)
    out_i8 = cluster_memory_forward(
        (x0, x1), (l0, l1), targets, indexes, nb, ndist, rampup, bank_i8,
        temp=temp, alpha=alpha, temp_dist=temp_dist, lambda1=lambda1,
        lambda2=lambda2, eps_consistency=eps_consistency)
    out_i8 = jax.block_until_ready(out_i8)
    for got, want in zip(out_i8, ref):
        np.testing.assert_allclose(float(got), float(want),
                                   rtol=5e-2, atol=5e-2)

    # 3) precise path: f32 bank (raw features -> wrapper prepares), exact
    #    reciprocal, single split / single tile.
    out_f32 = cluster_memory_forward(
        (x0, x1), (l0, l1), targets, indexes, nb, ndist, rampup, feats,
        temp=temp, alpha=alpha, temp_dist=temp_dist, lambda1=lambda1,
        lambda2=lambda2, eps_consistency=eps_consistency,
        feature_dtype=jnp.float32, approx_recip=False, num_splits=1)
    out_f32 = jax.block_until_ready(out_f32)
    for got, want in zip(out_f32, ref):
        np.testing.assert_allclose(float(got), float(want),
                                   rtol=1e-4, atol=1e-5)

    print("KERNEL_OK")
</pallas_src>

<mosaic_0001>
module attributes {stable_mosaic.version = 11 : i64} {
  func.func @_cm_fused_kernel(%arg0: i32, %arg1: i32, %arg2: memref<8x32xf32, #tpu.memory_space<vmem>>, %arg3: memref<128x32xbf16, #tpu.memory_space<vmem>>, %arg4: memref<2x128xf32, #tpu.memory_space<vmem>>, %arg5: memref<8x1xi32, #tpu.memory_space<vmem>>, %arg6: memref<8x200xf32, #tpu.memory_space<vmem>>, %arg7: memref<8x200xf32, #tpu.memory_space<vmem>>, %arg8: memref<8x4xi32, #tpu.memory_space<vmem>>, %arg9: memref<8x4xf32, #tpu.memory_space<vmem>>, %arg10: memref<8x4xf32, #tpu.memory_space<vmem>>, %arg11: memref<8x4xf32, #tpu.memory_space<vmem>>, %arg12: memref<1x8x1xf32, #tpu.memory_space<vmem>>, %arg13: memref<1x8x1xf32, #tpu.memory_space<vmem>>, %arg14: memref<1x1x128xf32, #tpu.memory_space<vmem>>, %arg15: memref<8x32xbf16, #tpu.memory_space<vmem>>, %arg16: memref<8x1xf32, #tpu.memory_space<vmem>>, %arg17: memref<8x1xf32, #tpu.memory_space<vmem>>, %arg18: memref<8x1xf32, #tpu.memory_space<vmem>>) attributes {dimension_semantics = [#tpu.dimension_semantics<parallel>, #tpu.dimension_semantics<arbitrary>], iteration_bounds = array<i64: 2, 1>, scalar_prefetch = 0 : i64, scratch_operands = 4 : i64, tpu.core_type = #tpu.core_type<tc>, window_params = [{pipeline_mode = #tpu.pipeline_mode<synchronous>, transform_indices = @transform_0, window_bounds = array<i64: 8, 32>}, {transform_indices = @transform_1, window_bounds = array<i64: 128, 32>}, {transform_indices = @transform_2, window_bounds = array<i64: 2, 128>}, {pipeline_mode = #tpu.pipeline_mode<synchronous>, transform_indices = @transform_3, window_bounds = array<i64: 8, 1>}, {pipeline_mode = #tpu.pipeline_mode<synchronous>, transform_indices = @transform_4, window_bounds = array<i64: 8, 200>}, {pipeline_mode = #tpu.pipeline_mode<synchronous>, transform_indices = @transform_5, window_bounds = array<i64: 8, 200>}, {pipeline_mode = #tpu.pipeline_mode<synchronous>, transform_indices = @transform_6, window_bounds = array<i64: 8, 4>}, {pipeline_mode = #tpu.pipeline_mode<synchronous>, transform_indices = @transform_7, window_bounds = array<i64: 8, 4>}, {pipeline_mode = #tpu.pipeline_mode<synchronous>, transform_indices = @transform_8, window_bounds = array<i64: 8, 4>}, {pipeline_mode = #tpu.pipeline_mode<synchronous>, transform_indices = @transform_9, window_bounds = array<i64: 8, 4>}, {transform_indices = @transform_10, window_bounds = array<i64: 1, 8, 1>}, {transform_indices = @transform_11, window_bounds = array<i64: 1, 8, 1>}, {transform_indices = @transform_12, window_bounds = array<i64: 1, 1, 128>}]} {
    %c0_i32 = arith.constant 0 : i32
    %0 = arith.cmpi eq, %arg1, %c0_i32 : i32
    %1 = arith.extui %0 : i1 to i32
    %c0_i32_0 = arith.constant 0 : i32
    %2 = arith.cmpi ne, %1, %c0_i32_0 : i32
    scf.if %2 {
      %c0_25 = arith.constant 0 : index
      %c0_26 = arith.constant 0 : index
      %44 = vector.load %arg2[%c0_25, %c0_26] : memref<8x32xf32, #tpu.memory_space<vmem>>, vector<8x32xf32>
      %45 = arith.mulf %44, %44 : vector<8x32xf32>
      %cst_27 = arith.constant dense<0.000000e+00> : vector<8xf32>
      %46 = vector.multi_reduction <add>, %45, %cst_27 [1] : vector<8x32xf32> to vector<8xf32>
      %47 = vector.shape_cast %46 : vector<8xf32> to vector<8x1xf32>
      %cst_28 = arith.constant 1.000000e-24 : f32
      %48 = vector.broadcast %cst_28 : f32 to vector<8x1xf32>
      %49 = arith.maximumf %47, %48 : vector<8x1xf32>
      %50 = math.rsqrt %49 : vector<8x1xf32>
      %cst_29 = arith.constant 2.000000e+01 : f32
      %51 = vector.broadcast %cst_29 : f32 to vector<8x1xf32>
      %52 = arith.mulf %50, %51 : vector<8x1xf32>
      %53 = vector.broadcast %52 : vector<8x1xf32> to vector<8x32xf32>
      %54 = arith.mulf %44, %53 : vector<8x32xf32>
      %55 = arith.truncf %54 : vector<8x32xf32> to vector<8x32xbf16>
      %c0_30 = arith.constant 0 : index
      %c0_31 = arith.constant 0 : index
      %56 = vector.load %arg15[%c0_30, %c0_31] : memref<8x32xbf16, #tpu.memory_space<vmem>>, vector<8x32xbf16>
      tpu.vector_store %arg15[%c0_30, %c0_31], %55 {strides = array<i32>} : memref<8x32xbf16, #tpu.memory_space<vmem>>, vector<8x32xbf16>,
      %cst_32 = arith.constant -1.000000e+30 : f32
      %57 = vector.broadcast %cst_32 : f32 to vector<8x1xf32>
      %c0_33 = arith.constant 0 : index
      %c0_34 = arith.constant 0 : index
      %58 = vector.load %arg16[%c0_33, %c0_34] : memref<8x1xf32, #tpu.memory_space<vmem>>, vector<8x1xf32>
      tpu.vector_store %arg16[%c0_33, %c0_34], %57 {strides = array<i32>} : memref<8x1xf32, #tpu.memory_space<vmem>>, vector<8x1xf32>,
      %cst_35 = arith.constant 0.000000e+00 : f32
      %59 = vector.broadcast %cst_35 : f32 to vector<8x1xf32>
      %c0_36 = arith.constant 0 : index
      %c0_37 = arith.constant 0 : index
      %60 = vector.load %arg17[%c0_36, %c0_37] : memref<8x1xf32, #tpu.memory_space<vmem>>, vector<8x1xf32>
      tpu.vector_store %arg17[%c0_36, %c0_37], %59 {strides = array<i32>} : memref<8x1xf32, #tpu.memory_space<vmem>>, vector<8x1xf32>,
      %cst_38 = arith.constant 0.000000e+00 : f32
      %61 = vector.broadcast %cst_38 : f32 to vector<8x1xf32>
      %c0_39 = arith.constant 0 : index
      %c0_40 = arith.constant 0 : index
      %62 = vector.load %arg18[%c0_39, %c0_40] : memref<8x1xf32, #tpu.memory_space<vmem>>, vector<8x1xf32>
      tpu.vector_store %arg18[%c0_39, %c0_40], %61 {strides = array<i32>} : memref<8x1xf32, #tpu.memory_space<vmem>>, vector<8x1xf32>,
      %c0_41 = arith.constant 0 : index
      %c0_42 = arith.constant 0 : index
      %63 = vector.load %arg6[%c0_41, %c0_42] : memref<8x200xf32, #tpu.memory_space<vmem>>, vector<8x200xf32>
      %c0_43 = arith.constant 0 : index
      %c0_44 = arith.constant 0 : index
      %64 = vector.load %arg7[%c0_43, %c0_44] : memref<8x200xf32, #tpu.memory_space<vmem>>, vector<8x200xf32>
      %c0_45 = arith.constant 0 : index
      %c0_46 = arith.constant 0 : index
      %65 = vector.load %arg5[%c0_45, %c0_46] : memref<8x1xi32, #tpu.memory_space<vmem>>, vector<8x1xi32>
      %cst_47 = arith.constant dense<0xFF800000> : vector<8xf32>
      %66 = vector.multi_reduction <maximumf>, %63, %cst_47 [1] : vector<8x200xf32> to vector<8xf32>
      %67 = vector.shape_cast %66 : vector<8xf32> to vector<8x1xf32>
      %68 = vector.broadcast %67 : vector<8x1xf32> to vector<8x200xf32>
      %69 = arith.subf %63, %68 : vector<8x200xf32>
      %70 = math.exp %69 : vector<8x200xf32>
      %cst_48 = arith.constant dense<0.000000e+00> : vector<8xf32>
      %71 = vector.multi_reduction <add>, %70, %cst_48 [1] : vector<8x200xf32> to vector<8xf32>
      %72 = vector.shape_cast %71 : vector<8xf32> to vector<8x1xf32>
      %73 = tpu.reciprocal %72 {approx = true} : vector<8x1xf32> -> vector<8x1xf32>
      %74 = vector.broadcast %73 : vector<8x1xf32> to vector<8x200xf32>
      %75 = arith.mulf %70, %74 : vector<8x200xf32>
      %cst_49 = arith.constant dense<0xFF800000> : vector<8xf32>
      %76 = vector.multi_reduction <maximumf>, %64, %cst_49 [1] : vector<8x200xf32> to vector<8xf32>
      %77 = vector.shape_cast %76 : vector<8xf32> to vector<8x1xf32>
      %78 = vector.broadcast %77 : vector<8x1xf32> to vector<8x200xf32>
      %79 = arith.subf %64, %78 : vector<8x200xf32>
      %80 = math.exp %79 : vector<8x200xf32>
      %cst_50 = arith.constant dense<0.000000e+00> : vector<8xf32>
      %81 = vector.multi_reduction <add>, %80, %cst_50 [1] : vector<8x200xf32> to vector<8xf32>
      %82 = vector.shape_cast %81 : vector<8xf32> to vector<8x1xf32>
      %83 = tpu.reciprocal %82 {approx = true} : vector<8x1xf32> -> vector<8x1xf32>
      %84 = vector.broadcast %83 : vector<8x1xf32> to vector<8x200xf32>
      %85 = arith.mulf %80, %84 : vector<8x200xf32>
      %cst_51 = arith.constant dense<0xFF800000> : vector<8xf32>
      %86 = vector.multi_reduction <maximumf>, %63, %cst_51 [1] : vector<8x200xf32> to vector<8xf32>
      %87 = vector.shape_cast %86 : vector<8xf32> to vector<8x1xf32>
      %88 = vector.broadcast %87 : vector<8x1xf32> to vector<8x200xf32>
      %89 = arith.subf %63, %88 : vector<8x200xf32>
      %90 = vector.broadcast %87 : vector<8x1xf32> to vector<8x200xf32>
      %91 = arith.subf %63, %90 : vector<8x200xf32>
      %92 = math.exp %91 : vector<8x200xf32>
      %cst_52 = arith.constant dense<0.000000e+00> : vector<8xf32>
      %93 = vector.multi_reduction <add>, %92, %cst_52 [1] : vector<8x200xf32> to vector<8xf32>
      %94 = vector.shape_cast %93 : vector<8xf32> to vector<8x1xf32>
      %95 = math.log %94 : vector<8x1xf32>
      %96 = vector.broadcast %95 : vector<8x1xf32> to vector<8x200xf32>
      %97 = arith.subf %89, %96 : vector<8x200xf32>
      %cst_53 = arith.constant dense<0xFF800000> : vector<8xf32>
      %98 = vector.multi_reduction <maximumf>, %64, %cst_53 [1] : vector<8x200xf32> to vector<8xf32>
      %99 = vector.shape_cast %98 : vector<8xf32> to vector<8x1xf32>
      %100 = vector.broadcast %99 : vector<8x1xf32> to vector<8x200xf32>
      %101 = arith.subf %64, %100 : vector<8x200xf32>
      %102 = vector.broadcast %99 : vector<8x1xf32> to vector<8x200xf32>
      %103 = arith.subf %64, %102 : vector<8x200xf32>
      %104 = math.exp %103 : vector<8x200xf32>
      %cst_54 = arith.constant dense<0.000000e+00> : vector<8xf32>
      %105 = vector.multi_reduction <add>, %104, %cst_54 [1] : vector<8x200xf32> to vector<8xf32>
      %106 = vector.shape_cast %105 : vector<8xf32> to vector<8x1xf32>
      %107 = math.log %106 : vector<8x1xf32>
      %108 = vector.broadcast %107 : vector<8x1xf32> to vector<8x200xf32>
      %109 = arith.subf %101, %108 : vector<8x200xf32>
      %c0_55 = arith.constant 0 : index
      %c0_56 = arith.constant 0 : index
      %110 = vector.load %arg9[%c0_55, %c0_56] : memref<8x4xf32, #tpu.memory_space<vmem>>, vector<8x4xf32>
      %cst_57 = arith.constant 1.000000e+01 : f32
      %111 = vector.broadcast %cst_57 : f32 to vector<8x4xf32>
      %112 = arith.mulf %110, %111 : vector<8x4xf32>
      %c0_58 = arith.constant 0 : index
      %c0_59 = arith.constant 0 : index
      %113 = vector.load %arg10[%c0_58, %c0_59] : memref<8x4xf32, #tpu.memory_space<vmem>>, vector<8x4xf32>
      %c0_60 = arith.constant 0 : index
      %c0_61 = arith.constant 0 : index
      %114 = vector.load %arg11[%c0_60, %c0_61] : memref<8x4xf32, #tpu.memory_space<vmem>>, vector<8x4xf32>
      %c0_62 = arith.constant 0 : index
      %c0_63 = arith.constant 0 : index
      %115 = vector.load %arg8[%c0_62, %c0_63] : memref<8x4xi32, #tpu.memory_space<vmem>>, vector<8x4xi32>
      %cst_64 = arith.constant dense<0.000000e+00> : vector<8xf32>
      %116 = vector.multi_reduction <add>, %113, %cst_64 [1] : vector<8x4xf32> to vector<8xf32>
      %117 = vector.shape_cast %116 : vector<8xf32> to vector<8x1xf32>
      %cst_65 = arith.constant 0.000000e+00 : f32
      %118 = vector.broadcast %cst_65 : f32 to vector<8x1xf32>
      %119 = arith.cmpf ogt, %117, %118 : vector<8x1xf32>
      %cst_66 = arith.constant 0.000000e+00 : f32
      %120 = vector.broadcast %cst_66 : f32 to vector<8x4xf32>
      %121 = arith.cmpf ogt, %113, %120 : vector<8x4xf32>
      %cst_67 = arith.constant -1.000000e+30 : f32
      %122 = vector.broadcast %cst_67 : f32 to vector<8x4xf32>
      %123 = arith.select %121, %112, %122 : vector<8x4xi1>, vector<8x4xf32>
      %cst_68 = arith.constant dense<0xFF800000> : vector<8xf32>
      %124 = vector.multi_reduction <maximumf>, %123, %cst_68 [1] : vector<8x4xf32> to vector<8xf32>
      %125 = vector.shape_cast %124 : vector<8xf32> to vector<8x1xf32>
      %cst_69 = arith.constant 0.000000e+00 : f32
      %126 = vector.broadcast %cst_69 : f32 to vector<8x1xf32>
      %127 = arith.select %119, %125, %126 : vector<8x1xi1>, vector<8x1xf32>
      %128 = vector.broadcast %127 : vector<8x1xf32> to vector<8x4xf32>
      %129 = arith.subf %112, %128 : vector<8x4xf32>
      %130 = math.exp %129 : vector<8x4xf32>
      %131 = arith.mulf %113, %130 : vector<8x4xf32>
      %cst_70 = arith.constant dense<0.000000e+00> : vector<8xf32>
      %132 = vector.multi_reduction <add>, %131, %cst_70 [1] : vector<8x4xf32> to vector<8xf32>
      %133 = vector.shape_cast %132 : vector<8xf32> to vector<8x1xf32>
      %cst_71 = arith.constant 1.000000e-30 : f32
      %134 = vector.broadcast %cst_71 : f32 to vector<8x1xf32>
      %135 = arith.maximumf %133, %134 : vector<8x1xf32>
      %cst_72 = arith.constant 5.000000e-01 : f32
      %136 = vector.broadcast %cst_72 : f32 to vector<8x1xf32>
      %137 = arith.divf %136, %135 : vector<8x1xf32>
      %cst_73 = arith.constant 0.000000e+00 : f32
      %138 = vector.broadcast %cst_73 : f32 to vector<8x1xf32>
      %139 = arith.select %119, %137, %138 : vector<8x1xi1>, vector<8x1xf32>
      %140 = vector.broadcast %139 : vector<8x1xf32> to vector<8x4xf32>
      %141 = arith.mulf %131, %140 : vector<8x4xf32>
      %cst_74 = arith.constant dense<0.000000e+00> : vector<8xf32>
      %142 = vector.multi_reduction <add>, %114, %cst_74 [1] : vector<8x4xf32> to vector<8xf32>
      %143 = vector.shape_cast %142 : vector<8xf32> to vector<8x1xf32>
      %cst_75 = arith.constant 0.000000e+00 : f32
      %144 = vector.broadcast %cst_75 : f32 to vector<8x1xf32>
      %145 = arith.cmpf ogt, %143, %144 : vector<8x1xf32>
      %cst_76 = arith.constant 1.000000e-30 : f32
      %146 = vector.broadcast %cst_76 : f32 to vector<8x1xf32>
      %147 = arith.maximumf %143, %146 : vector<8x1xf32>
      %cst_77 = arith.constant 1.000000e+00 : f32
      %148 = vector.broadcast %cst_77 : f32 to vector<8x1xf32>
      %149 = arith.divf %148, %147 : vector<8x1xf32>
      %cst_78 = arith.constant 0.000000e+00 : f32
      %150 = vector.broadcast %cst_78 : f32 to vector<8x1xf32>
      %151 = arith.select %145, %149, %150 : vector<8x1xi1>, vector<8x1xf32>
      %152 = vector.broadcast %151 : vector<8x1xf32> to vector<8x4xf32>
      %153 = arith.mulf %114, %152 : vector<8x4xf32>
      %154 = tpu.iota {dimensions = array<i32: 1>} : vector<8x8xi32>
      %cst_79 = arith.constant 0.000000e+00 : f32
      %155 = vector.broadcast %cst_79 : f32 to vector<8x8xf32>
      %cst_80 = arith.constant 0.000000e+00 : f32
      %156 = vector.broadcast %cst_80 : f32 to vector<8x8xf32>
      %157 = vector.extract_strided_slice %115 {offsets = [0, 0], sizes = [8, 1], strides = [1, 1]} : vector<8x4xi32> to vector<8x1xi32>
      %158 = vector.broadcast %157 : vector<8x1xi32> to vector<8x8xi32>
      %159 = arith.cmpi eq, %154, %158 : vector<8x8xi32>
      %160 = arith.extui %159 : vector<8x8xi1> to vector<8x8xi32>
      %161 = arith.sitofp %160 : vector<8x8xi32> to vector<8x8xf32>
      %162 = vector.extract_strided_slice %141 {offsets = [0, 0], sizes = [8, 1], strides = [1, 1]} : vector<8x4xf32> to vector<8x1xf32>
      %163 = vector.broadcast %162 : vector<8x1xf32> to vector<8x8xf32>
      %164 = arith.mulf %161, %163 : vector<8x8xf32>
      %165 = arith.addf %155, %164 : vector<8x8xf32>
      %166 = vector.extract_strided_slice %153 {offsets = [0, 0], sizes = [8, 1], strides = [1, 1]} : vector<8x4xf32> to vector<8x1xf32>
      %167 = vector.broadcast %166 : vector<8x1xf32> to vector<8x8xf32>
      %168 = arith.mulf %161, %167 : vector<8x8xf32>
      %169 = arith.addf %156, %168 : vector<8x8xf32>
      %170 = vector.extract_strided_slice %115 {offsets = [0, 1], sizes = [8, 1], strides = [1, 1]} : vector<8x4xi32> to vector<8x1xi32>
      %171 = vector.broadcast %170 : vector<8x1xi32> to vector<8x8xi32>
      %172 = arith.cmpi eq, %154, %171 : vector<8x8xi32>
      %173 = arith.extui %172 : vector<8x8xi1> to vector<8x8xi32>
      %174 = arith.sitofp %173 : vector<8x8xi32> to vector<8x8xf32>
      %175 = vector.extract_strided_slice %141 {offsets = [0, 1], sizes = [8, 1], strides = [1, 1]} : vector<8x4xf32> to vector<8x1xf32>
      %176 = vector.broadcast %175 : vector<8x1xf32> to vector<8x8xf32>
      %177 = arith.mulf %174, %176 : vector<8x8xf32>
      %178 = arith.addf %165, %177 : vector<8x8xf32>
      %179 = vector.extract_strided_slice %153 {offsets = [0, 1], sizes = [8, 1], strides = [1, 1]} : vector<8x4xf32> to vector<8x1xf32>
      %180 = vector.broadcast %179 : vector<8x1xf32> to vector<8x8xf32>
      %181 = arith.mulf %174, %180 : vector<8x8xf32>
      %182 = arith.addf %169, %181 : vector<8x8xf32>
      %183 = vector.extract_strided_slice %115 {offsets = [0, 2], sizes = [8, 1], strides = [1, 1]} : vector<8x4xi32> to vector<8x1xi32>
      %184 = vector.broadcast %183 : vector<8x1xi32> to vector<8x8xi32>
      %185 = arith.cmpi eq, %154, %184 : vector<8x8xi32>
      %186 = arith.extui %185 : vector<8x8xi1> to vector<8x8xi32>
      %187 = arith.sitofp %186 : vector<8x8xi32> to vector<8x8xf32>
      %188 = vector.extract_strided_slice %141 {offsets = [0, 2], sizes = [8, 1], strides = [1, 1]} : vector<8x4xf32> to vector<8x1xf32>
      %189 = vector.broadcast %188 : vector<8x1xf32> to vector<8x8xf32>
      %190 = arith.mulf %187, %189 : vector<8x8xf32>
      %191 = arith.addf %178, %190 : vector<8x8xf32>
      %192 = vector.extract_strided_slice %153 {offsets = [0, 2], sizes = [8, 1], strides = [1, 1]} : vector<8x4xf32> to vector<8x1xf32>
      %193 = vector.broadcast %192 : vector<8x1xf32> to vector<8x8xf32>
      %194 = arith.mulf %187, %193 : vector<8x8xf32>
      %195 = arith.addf %182, %194 : vector<8x8xf32>
      %196 = vector.extract_strided_slice %115 {offsets = [0, 3], sizes = [8, 1], strides = [1, 1]} : vector<8x4xi32> to vector<8x1xi32>
      %197 = vector.broadcast %196 : vector<8x1xi32> to vector<8x8xi32>
      %198 = arith.cmpi eq, %154, %197 : vector<8x8xi32>
      %199 = arith.extui %198 : vector<8x8xi1> to vector<8x8xi32>
      %200 = arith.sitofp %199 : vector<8x8xi32> to vector<8x8xf32>
      %201 = vector.extract_strided_slice %141 {offsets = [0, 3], sizes = [8, 1], strides = [1, 1]} : vector<8x4xf32> to vector<8x1xf32>
      %202 = vector.broadcast %201 : vector<8x1xf32> to vector<8x8xf32>
      %203 = arith.mulf %200, %202 : vector<8x8xf32>
      %204 = arith.addf %191, %203 : vector<8x8xf32>
      %205 = vector.extract_strided_slice %153 {offsets = [0, 3], sizes = [8, 1], strides = [1, 1]} : vector<8x4xf32> to vector<8x1xf32>
      %206 = vector.broadcast %205 : vector<8x1xf32> to vector<8x8xf32>
      %207 = arith.mulf %200, %206 : vector<8x8xf32>
      %208 = arith.addf %195, %207 : vector<8x8xf32>
      %209 = arith.addf %75, %85 : vector<8x200xf32>
      %cst_81 = arith.constant dense<0.000000e+00> : vector<8x200xf32>
      %210 = tpu.matmul %204, %209, %cst_81 {dimension_numbers = #tpu.dot_dimension_numbers<[1], [0], [0], [1], [0, 0, 1, 1], [], []>} : vector<8x8xf32>, vector<8x200xf32>, vector<8x200xf32> -> vector<8x200xf32>
      %cst_82 = arith.constant dense<0.000000e+00> : vector<8x200xf32>
      %211 = tpu.matmul %208, %75, %cst_82 {dimension_numbers = #tpu.dot_dimension_numbers<[1], [0], [0], [1], [0, 0, 1, 1], [], []>} : vector<8x8xf32>, vector<8x200xf32>, vector<8x200xf32> -> vector<8x200xf32>
      %212 = tpu.iota {dimensions = array<i32: 1>} : vector<8x200xi32>
      %213 = vector.broadcast %65 : vector<8x1xi32> to vector<8x200xi32>
      %214 = arith.cmpi eq, %212, %213 : vector<8x200xi32>
      %215 = arith.extui %214 : vector<8x200xi1> to vector<8x200xi32>
      %216 = arith.sitofp %215 : vector<8x200xi32> to vector<8x200xf32>
      %cst_83 = arith.constant 0.699999988 : f32
      %217 = vector.broadcast %cst_83 : f32 to vector<8x200xf32>
      %218 = arith.mulf %217, %216 : vector<8x200xf32>
      %cst_84 = arith.constant 3.000000e-01 : f32
      %219 = vector.broadcast %cst_84 : f32 to vector<8x200xf32>
      %220 = arith.mulf %219, %210 : vector<8x200xf32>
      %221 = arith.addf %218, %220 : vector<8x200xf32>
      %cst_85 = arith.constant 0.000000e+00 : f32
      %222 = vector.broadcast %cst_85 : f32 to vector<8x200xf32>
      %223 = arith.subf %222, %221 : vector<8x200xf32>
      %224 = arith.mulf %223, %97 : vector<8x200xf32>
      %cst_86 = arith.constant dense<0.000000e+00> : vector<8xf32>
      %225 = vector.multi_reduction <add>, %224, %cst_86 [1] : vector<8x200xf32> to vector<8xf32>
      %226 = vector.shape_cast %225 : vector<8xf32> to vector<8x1xf32>
      %cst_87 = arith.constant dense<0.000000e+00> : vector<1xf32>
      %227 = vector.multi_reduction <add>, %226, %cst_87 [0] : vector<8x1xf32> to vector<1xf32>
      %228 = vector.shape_cast %227 : vector<1xf32> to vector<1x1xf32>
      %cst_88 = arith.constant 1.250000e-01 : f32
      %229 = vector.broadcast %cst_88 : f32 to vector<1x1xf32>
      %230 = arith.mulf %228, %229 : vector<1x1xf32>
      %cst_89 = arith.constant 0.000000e+00 : f32
      %231 = vector.broadcast %cst_89 : f32 to vector<8x200xf32>
      %232 = arith.cmpf ogt, %211, %231 : vector<8x200xf32>
      %cst_90 = arith.constant 1.000000e-30 : f32
      %233 = vector.broadcast %cst_90 : f32 to vector<8x200xf32>
      %234 = arith.maximumf %211, %233 : vector<8x200xf32>
      %235 = math.log %234 : vector<8x200xf32>
      %236 = arith.mulf %211, %235 : vector<8x200xf32>
      %cst_91 = arith.constant 0.000000e+00 : f32
      %237 = vector.broadcast %cst_91 : f32 to vector<8x200xf32>
      %238 = arith.select %232, %236, %237 : vector<8x200xi1>, vector<8x200xf32>
      %239 = arith.mulf %211, %109 : vector<8x200xf32>
      %240 = arith.subf %238, %239 : vector<8x200xf32>
      %cst_92 = arith.constant dense<0.000000e+00> : vector<8xf32>
      %241 = vector.multi_reduction <add>, %240, %cst_92 [1] : vector<8x200xf32> to vector<8xf32>
      %242 = vector.shape_cast %241 : vector<8xf32> to vector<8x1xf32>
      %cst_93 = arith.constant dense<0.000000e+00> : vector<1xf32>
      %243 = vector.multi_reduction <add>, %242, %cst_93 [0] : vector<8x1xf32> to vector<1xf32>
      %244 = vector.shape_cast %243 : vector<1xf32> to vector<1x1xf32>
      %cst_94 = arith.constant 1.250000e-01 : f32
      %245 = vector.broadcast %cst_94 : f32 to vector<1x1xf32>
      %246 = arith.mulf %244, %245 : vector<1x1xf32>
      %247 = tpu.iota {dimensions = array<i32: 1>} : vector<1x128xi32>
      %c0_i32_95 = arith.constant 0 : i32
      %248 = vector.broadcast %c0_i32_95 : i32 to vector<1x128xi32>
      %249 = arith.cmpi eq, %247, %248 : vector<1x128xi32>
      %c1_i32_96 = arith.constant 1 : i32
      %250 = vector.broadcast %c1_i32_96 : i32 to vector<1x128xi32>
      %251 = arith.cmpi eq, %247, %250 : vector<1x128xi32>
      %cst_97 = arith.constant 0.000000e+00 : f32
      %252 = vector.shape_cast %246 : vector<1x1xf32> to vector<1x1xf32>
      %253 = vector.broadcast %252 : vector<1x1xf32> to vector<1x128xf32>
      %254 = vector.broadcast %cst_97 : f32 to vector<1x128xf32>
      %255 = arith.select %251, %253, %254 : vector<1x128xi1>, vector<1x128xf32>
      %256 = vector.shape_cast %230 : vector<1x1xf32> to vector<1x1xf32>
      %257 = vector.broadcast %256 : vector<1x1xf32> to vector<1x128xf32>
      %258 = arith.select %249, %257, %255 : vector<1x128xi1>, vector<1x128xf32>
      %259 = vector.shape_cast %258 : vector<1x128xf32> to vector<1x1x128xf32>
      %c0_98 = arith.constant 0 : index
      %c0_99 = arith.constant 0 : index
      %c0_100 = arith.constant 0 : index
      %260 = vector.load %arg14[%c0_98, %c0_99, %c0_100] : memref<1x1x128xf32, #tpu.memory_space<vmem>>, vector<1x1x128xf32>
      tpu.vector_store %arg14[%c0_98, %c0_99, %c0_100], %259 {strides = array<i32>} : memref<1x1x128xf32, #tpu.memory_space<vmem>>, vector<1x1x128xf32>,
    } else {
    }
    %c0 = arith.constant 0 : index
    %c0_1 = arith.constant 0 : index
    %3 = vector.load %arg3[%c0, %c0_1] : memref<128x32xbf16, #tpu.memory_space<vmem>>, vector<128x32xbf16>
    %c0_2 = arith.constant 0 : index
    %c0_3 = arith.constant 0 : index
    %4 = vector.load %arg15[%c0_2, %c0_3] : memref<8x32xbf16, #tpu.memory_space<vmem>>, vector<8x32xbf16>
    %cst = arith.constant dense<0.000000e+00> : vector<8x128xf32>
    %5 = tpu.matmul %4, %3, %cst {dimension_numbers = #tpu.dot_dimension_numbers<[1], [1], [0], [0], [0, 0, 1, 0], [], []>} : vector<8x32xbf16>, vector<128x32xbf16>, vector<8x128xf32> -> vector<8x128xf32>
    %c1 = arith.constant 1 : index
    %c0_4 = arith.constant 0 : index
    %6 = vector.load %arg4[%c1, %c0_4] : memref<2x128xf32, #tpu.memory_space<vmem>>, vector<1x128xf32>
    %7 = vector.broadcast %6 : vector<1x128xf32> to vector<8x128xf32>
    %8 = arith.addf %5, %7 : vector<8x128xf32>
    %c0_5 = arith.constant 0 : index
    %c0_6 = arith.constant 0 : index
    %9 = vector.load %arg16[%c0_5, %c0_6] : memref<8x1xf32, #tpu.memory_space<vmem>>, vector<8x1xf32>
    %cst_7 = arith.constant dense<0xFF800000> : vector<8xf32>
    %10 = vector.multi_reduction <maximumf>, %8, %cst_7 [1] : vector<8x128xf32> to vector<8xf32>
    %11 = vector.shape_cast %10 : vector<8xf32> to vector<8x1xf32>
    %12 = arith.maximumf %9, %11 : vector<8x1xf32>
    %c0_8 = arith.constant 0 : index
    %c0_9 = arith.constant 0 : index
    %13 = vector.load %arg17[%c0_8, %c0_9] : memref<8x1xf32, #tpu.memory_space<vmem>>, vector<8x1xf32>
    %14 = arith.subf %9, %12 : vector<8x1xf32>
    %15 = math.exp %14 : vector<8x1xf32>
    %16 = arith.mulf %13, %15 : vector<8x1xf32>
    %17 = vector.broadcast %12 : vector<8x1xf32> to vector<8x128xf32>
    %18 = arith.subf %8, %17 : vector<8x128xf32>
    %19 = math.exp %18 : vector<8x128xf32>
    %cst_10 = arith.constant dense<0.000000e+00> : vector<8xf32>
    %20 = vector.multi_reduction <add>, %19, %cst_10 [1] : vector<8x128xf32> to vector<8xf32>
    %21 = vector.shape_cast %20 : vector<8xf32> to vector<8x1xf32>
    %22 = arith.addf %16, %21 : vector<8x1xf32>
    %c0_11 = arith.constant 0 : index
    %c0_12 = arith.constant 0 : index
    %23 = vector.load %arg17[%c0_11, %c0_12] : memref<8x1xf32, #tpu.memory_space<vmem>>, vector<8x1xf32>
    tpu.vector_store %arg17[%c0_11, %c0_12], %22 {strides = array<i32>} : memref<8x1xf32, #tpu.memory_space<vmem>>, vector<8x1xf32>,
    %c0_13 = arith.constant 0 : index
    %c0_14 = arith.constant 0 : index
    %24 = vector.load %arg16[%c0_13, %c0_14] : memref<8x1xf32, #tpu.memory_space<vmem>>, vector<8x1xf32>
    tpu.vector_store %arg16[%c0_13, %c0_14], %12 {strides = array<i32>} : memref<8x1xf32, #tpu.memory_space<vmem>>, vector<8x1xf32>,
    %25 = tpu.iota {dimensions = array<i32: 1>} : vector<8x128xi32>
    %c0_15 = arith.constant 0 : index
    %c0_16 = arith.constant 0 : index
    %26 = vector.load %arg5[%c0_15, %c0_16] : memref<8x1xi32, #tpu.memory_space<vmem>>, vector<8x1xi32>
    %c1_i32 = arith.constant 1 : i32
    %27 = arith.muli %arg0, %c1_i32 : i32
    %28 = arith.addi %27, %arg1 : i32
    %c128_i32 = arith.constant 128 : i32
    %29 = arith.muli %28, %c128_i32 : i32
    %30 = vector.broadcast %29 : i32 to vector<8x1xi32>
    %31 = arith.subi %26, %30 : vector<8x1xi32>
    %c0_17 = arith.constant 0 : index
    %c0_18 = arith.constant 0 : index
    %32 = vector.load %arg18[%c0_17, %c0_18] : memref<8x1xf32, #tpu.memory_space<vmem>>, vector<8x1xf32>
    %33 = vector.broadcast %31 : vector<8x1xi32> to vector<8x128xi32>
    %34 = arith.cmpi eq, %25, %33 : vector<8x128xi32>
    %cst_19 = arith.constant 0.000000e+00 : f32
    %35 = vector.broadcast %cst_19 : f32 to vector<8x128xf32>
    %36 = arith.select %34, %8, %35 : vector<8x128xi1>, vector<8x128xf32>
    %cst_20 = arith.constant dense<0.000000e+00> : vector<8xf32>
    %37 = vector.multi_reduction <add>, %36, %cst_20 [1] : vector<8x128xf32> to vector<8xf32>
    %38 = vector.shape_cast %37 : vector<8xf32> to vector<8x1xf32>
    %39 = arith.addf %32, %38 : vector<8x1xf32>
    %c0_21 = arith.constant 0 : index
    %c0_22 = arith.constant 0 : index
    %40 = vector.load %arg18[%c0_21, %c0_22] : memref<8x1xf32, #tpu.memory_space<vmem>>, vector<8x1xf32>
    tpu.vector_store %arg18[%c0_21, %c0_22], %39 {strides = array<i32>} : memref<8x1xf32, #tpu.memory_space<vmem>>, vector<8x1xf32>,
    %c0_i32_23 = arith.constant 0 : i32
    %41 = arith.cmpi eq, %arg1, %c0_i32_23 : i32
    %42 = arith.extui %41 : i1 to i32
    %c0_i32_24 = arith.constant 0 : i32
    %43 = arith.cmpi ne, %42, %c0_i32_24 : i32
    scf.if %43 {
      %c0_25 = arith.constant 0 : index
      %c0_26 = arith.constant 0 : index
      %44 = vector.load %arg16[%c0_25, %c0_26] : memref<8x1xf32, #tpu.memory_space<vmem>>, vector<8x1xf32>
      %c0_27 = arith.constant 0 : index
      %c0_28 = arith.constant 0 : index
      %45 = vector.load %arg17[%c0_27, %c0_28] : memref<8x1xf32, #tpu.memory_space<vmem>>, vector<8x1xf32>
      %46 = math.log %45 : vector<8x1xf32>
      %47 = arith.addf %44, %46 : vector<8x1xf32>
      %48 = vector.shape_cast %47 : vector<8x1xf32> to vector<1x8x1xf32>
      %c0_29 = arith.constant 0 : index
      %c0_30 = arith.constant 0 : index
      %c0_31 = arith.constant 0 : index
      %49 = vector.load %arg12[%c0_29, %c0_30, %c0_31] : memref<1x8x1xf32, #tpu.memory_space<vmem>>, vector<1x8x1xf32>
      tpu.vector_store %arg12[%c0_29, %c0_30, %c0_31], %48 {strides = array<i32>} : memref<1x8x1xf32, #tpu.memory_space<vmem>>, vector<1x8x1xf32>,
      %c0_32 = arith.constant 0 : index
      %c0_33 = arith.constant 0 : index
      %50 = vector.load %arg18[%c0_32, %c0_33] : memref<8x1xf32, #tpu.memory_space<vmem>>, vector<8x1xf32>
      %51 = vector.shape_cast %50 : vector<8x1xf32> to vector<1x8x1xf32>
      %c0_34 = arith.constant 0 : index
      %c0_35 = arith.constant 0 : index
      %c0_36 = arith.constant 0 : index
      %52 = vector.load %arg13[%c0_34, %c0_35, %c0_36] : memref<1x8x1xf32, #tpu.memory_space<vmem>>, vector<1x8x1xf32>
      tpu.vector_store %arg13[%c0_34, %c0_35, %c0_36], %51 {strides = array<i32>} : memref<1x8x1xf32, #tpu.memory_space<vmem>>, vector<1x8x1xf32>,
    } else {
    }
    return
  }
  func.func @transform_0(%arg0: i32, %arg1: i32) -> (i32, i32) {
    %c0_i32 = arith.constant 0 : i32
    %c0_i32_0 = arith.constant 0 : i32
    %c0_i32_1 = arith.constant 0 : i32
    return %c0_i32, %c0_i32_0 : i32, i32
  }
  func.func @transform_1(%arg0: i32, %arg1: i32) -> (i32, i32) {
    %c1_i32 = arith.constant 1 : i32
    %0 = arith.muli %arg0, %c1_i32 : i32
    %1 = arith.addi %0, %arg1 : i32
    %c0_i32 = arith.constant 0 : i32
    %c0_i32_0 = arith.constant 0 : i32
    return %1, %c0_i32 : i32, i32
  }
  func.func @transform_2(%arg0: i32, %arg1: i32) -> (i32, i32) {
    %c1_i32 = arith.constant 1 : i32
    %0 = arith.muli %arg0, %c1_i32 : i32
    %1 = arith.addi %0, %arg1 : i32
    %c0_i32 = arith.constant 0 : i32
    %c0_i32_0 = arith.constant 0 : i32
    return %c0_i32, %1 : i32, i32
  }
  func.func @transform_3(%arg0: i32, %arg1: i32) -> (i32, i32) {
    %c0_i32 = arith.constant 0 : i32
    %c0_i32_0 = arith.constant 0 : i32
    %c0_i32_1 = arith.constant 0 : i32
    return %c0_i32, %c0_i32_0 : i32, i32
  }
  func.func @transform_4(%arg0: i32, %arg1: i32) -> (i32, i32) {
    %c0_i32 = arith.constant 0 : i32
    %c0_i32_0 = arith.constant 0 : i32
    %c0_i32_1 = arith.constant 0 : i32
    return %c0_i32, %c0_i32_0 : i32, i32
  }
  func.func @transform_5(%arg0: i32, %arg1: i32) -> (i32, i32) {
    %c0_i32 = arith.constant 0 : i32
    %c0_i32_0 = arith.constant 0 : i32
    %c0_i32_1 = arith.constant 0 : i32
    return %c0_i32, %c0_i32_0 : i32, i32
  }
  func.func @transform_6(%arg0: i32, %arg1: i32) -> (i32, i32) {
    %c0_i32 = arith.constant 0 : i32
    %c0_i32_0 = arith.constant 0 : i32
    %c0_i32_1 = arith.constant 0 : i32
    return %c0_i32, %c0_i32_0 : i32, i32
  }
  func.func @transform_7(%arg0: i32, %arg1: i32) -> (i32, i32) {
    %c0_i32 = arith.constant 0 : i32
    %c0_i32_0 = arith.constant 0 : i32
    %c0_i32_1 = arith.constant 0 : i32
    return %c0_i32, %c0_i32_0 : i32, i32
  }
  func.func @transform_8(%arg0: i32, %arg1: i32) -> (i32, i32) {
    %c0_i32 = arith.constant 0 : i32
    %c0_i32_0 = arith.constant 0 : i32
    %c0_i32_1 = arith.constant 0 : i32
    return %c0_i32, %c0_i32_0 : i32, i32
  }
  func.func @transform_9(%arg0: i32, %arg1: i32) -> (i32, i32) {
    %c0_i32 = arith.constant 0 : i32
    %c0_i32_0 = arith.constant 0 : i32
    %c0_i32_1 = arith.constant 0 : i32
    return %c0_i32, %c0_i32_0 : i32, i32
  }
  func.func @transform_10(%arg0: i32, %arg1: i32) -> (i32, i32, i32) {
    %c0_i32 = arith.constant 0 : i32
    %c0_i32_0 = arith.constant 0 : i32
    %c0_i32_1 = arith.constant 0 : i32
    return %arg0, %c0_i32, %c0_i32_0 : i32, i32, i32
  }
  func.func @transform_11(%arg0: i32, %arg1: i32) -> (i32, i32, i32) {
    %c0_i32 = arith.constant 0 : i32
    %c0_i32_0 = arith.constant 0 : i32
    %c0_i32_1 = arith.constant 0 : i32
    return %arg0, %c0_i32, %c0_i32_0 : i32, i32, i32
  }
  func.func @transform_12(%arg0: i32, %arg1: i32) -> (i32, i32, i32) {
    %c0_i32 = arith.constant 0 : i32
    %c0_i32_0 = arith.constant 0 : i32
    %c0_i32_1 = arith.constant 0 : i32
    return %arg0, %c0_i32, %c0_i32_0 : i32, i32, i32
  }
}

</mosaic_0001>

<bundles_post_ra>
// kernel: tpu_custom_call.1
= control target key start
LH: loop header
LB: loop body
LE: loop exit
PB: predicated region body
PF: predicated region fallthrough
CT: control target
= control target key end

     0   :  { %s1861_s0 = inlined_call_operand.vmem [shape: f32[8,32], index: 0, kind: input, shape index: {}]   ;;  %s1862_s1 = inlined_call_operand.vmem [shape: bf16[256,32], index: 1, kind: input, shape index: {}]   ;;  %s1863_s2 = inlined_call_operand.vmem [shape: f32[2,256], index: 2, kind: input, shape index: {}]   ;;  %s1864_s3 = inlined_call_operand.vmem [shape: s32[8,1], index: 3, kind: input, shape index: {}]   ;;  %s1865_s4 = inlined_call_operand.vmem [shape: f32[8,200], index: 4, kind: input, shape index: {}]   ;;  %s1866_s5 = inlined_call_operand.vmem [shape: f32[8,200], index: 5, kind: input, shape index: {}]   ;;  %s1867_s6 = inlined_call_operand.vmem [shape: s32[8,4], index: 6, kind: input, shape index: {}]   ;;  %s1868_s7 = inlined_call_operand.vmem [shape: f32[8,4], index: 7, kind: input, shape index: {}]   ;;  %s1869_s8 = inlined_call_operand.vmem [shape: f32[8,4], index: 8, kind: input, shape index: {}]   ;;  %s1870_s9 = inlined_call_operand.vmem [shape: f32[8,4], index: 9, kind: input, shape index: {}]   ;;  %s1871_s10 = inlined_call_operand.vmem [shape: f32[2,8,1], index: 10, kind: output, shape index: {0}]   ;;  %s1872_s11 = inlined_call_operand.vmem [shape: f32[2,8,1], index: 11, kind: output, shape index: {1}]   ;;  %s1873_s12 = inlined_call_operand.hbm [shape: f32[2,1,128], index: 12, kind: output, shape index: {2}]  }
   0x1   :  { %1874 = sst [smem:[#allocation9_spill]] %s1861_s0 }
   0x2   :  { %1875 = sst [smem:[#allocation10_spill]] %s1862_s1 }
   0x3   :  { %1876 = sst [smem:[#allocation11_spill]] %s1863_s2 }
   0x4   :  { %18 = vsyncpa [#allocation7], 0 }
   0x5   :  { %20 = vsyncpa [#allocation7 + $0x1], 0  ;;  %s1535_s21 = smov 0   ;;  %s1537_s22 = smov 0  }
   0x6   :  { %s1539_s23 = smov 0   ;;  %s1541_s24 = smov 0  }
   0x7   :  { %s1543_s25 = smov 0   ;;  %s1545_s26 = smov 0  }
   0x8 LB: > { %s1205_s27 = sadd.s32 4294967295, %s1460_s26   ;;  %s1206_s28 = sadd.s32 4294967294, %s1460_s26   ;;  %s1460_s26 = sphi %s1545_s26, %s26_s26   ;;  %s1456_s25 = sphi %s1543_s25, %s1886_s25   ;;  %s1452_s24 = sphi %s1541_s24, %s1885_s24   ;;  %s1448_s23 = sphi %s1539_s23, %s1884_s23   ;;  %s1444_s22 = sphi %s1537_s22, %s1883_s22   ;;  %s1440_s21 = sphi %s1535_s21, %s1882_s21  }
   0x9   : > { %s38_s29 = sadd.s32 1, %s1456_s25  ;;  %s321_s30 = sadd.s32 1, %s1448_s23 }
   0xa   : > { %p40_p0 = scmp.ge.s32.totalorder %s38_s29, 2  ;;  %p331_p1 = scmp.ne.s32.totalorder %s1448_s23, %s1444_s22 }
   0xb   : > { %p332_p2 = scmp.eq.s32.totalorder %s1205_s27, 1  ;;  %p337_p3 = scmp.ne.s32.totalorder %s1444_s22, %s1440_s21 }
   0xc   : > { %s1888_s29 = smov (%p40_p0, %s38_s29), 0  ;;  %p338_p5 = scmp.eq.s32.totalorder %s1206_s28, 1 }
   0xd   : > { %p1575_p4 = por %p332_p2, %p331_p1  ;;  %s318_s14 = ssub.s32 %s1456_s25, %s1888_s29 }
   0xe   : > { %p1209_p6 = scmp.ge.s32.totalorder %s1460_s26, 1  ;;  %p319_p7 = scmp.eq.s32.totalorder %s318_s14, 0 }
   0xf   : > { %p1582_p8 = por %p338_p5, %p337_p3  ;;  %p400_p9 = scmp.lt.s32.totalorder %s1460_s26, 3 }
  0x10   : > { %s1588_s16 = scalar_select %p319_p7, %s1448_s23, %s321_s30  }
  0x11   : > { %p401_p10 = pnand %p1209_p6, %p400_p9 }
  0x12   : > { %v1593_v0 = vld [vmem:[%s1869_s8] sm:$0xff] (!%p401_p10)  ;;  %vm552_vm0 = vcmask (!%p401_p10), 31744   ;;  %s1879_s0 = sld [smem:[#allocation9_spill]] (!%p401_p10)  ;;  %vm484_vm1 = vcmask (!%p401_p10), 261120   ;;  %vm504_vm2 = vcmask (!%p401_p10), 588800   ;;  %v1613_v6 = vld [vmem:[%s1866_s5 + $0x8] sm:$0xff] (!%p401_p10) }
  0x13   : > { %404 = sbr.rel (%p401_p10) target bundleno = 909 (0x38d), region = 60  ;;  %v547_v2 = vld [vmem:[%s1868_s7] sm:$0xff] (!%p401_p10)  ;;  %v553_v3 = vsel (!%p401_p10), %vm552_vm0, %v1593_v0, 0.0  ;;  %vm557_vm3 = vcmp.gt.f32.partialorder (!%p401_p10), %v1593_v0, 0.0  ;;  %v1628_v9 = vld [vmem:[%s1865_s4 + $0x8] sm:$0xff] (!%p401_p10)  ;;  %v522_v12 = vsel (!%p401_p10), %vm504_vm2, %v1613_v6, -inf }
  0x14   : > { %v1607_v5 = vmul.f32 (!%p401_p10), 10.0, %v547_v2  ;;  %v1618_v7 = vld [vmem:[%s1865_s4] sm:$0xff] (!%p401_p10)  ;;  %554 = vadd.xlane.f32.xlu0 (!%p401_p10), %v553_v3  ;;  %v505_v13 = vsel (!%p401_p10), %vm504_vm2, %v1628_v9, -inf  ;;  %v1462_v14 = vmov (!%p401_p10), 0.0   ;;  %s1880_s1 = sld [smem:[#allocation10_spill]] (!%p401_p10)  ;;  %vm1463_vm4 = vmmov (!%p401_p10), 0  }
  0x15   : > { %v1623_v8 = vld [vmem:[%s1866_s5] sm:$0xff] (!%p401_p10)  ;;  %1246 = vmatprep.subr.bf16.mxu0 (!%p401_p10), %v1462_v14  ;;  %730 = vmatprep.mubr.f32.mxu1 (!%p401_p10), %v1462_v14  ;;  %v506_v16 = vmax.f32 (!%p401_p10), %v1618_v7, %v505_v13  ;;  %v1464_v31 = vmov (!%p401_p10), 0   ;;  %v1465_v37 = vmov (!%p401_p10), 1   ;;  %vm493_vm6 = vcmask (!%p401_p10), 257024   ;;  %p464_p12 = scmp.lt.s32.totalorder (!%p401_p10), %s1452_s24, 1  ;;  %s1881_s2 = sld [smem:[#allocation11_spill]] (!%p401_p10) }
  0x16   : > { %v558_v11 = vsel (!%p401_p10), %vm557_vm3, %v1607_v5, -1e+30  ;;  %v523_v17 = vmax.f32 (!%p401_p10), %v1623_v8, %v522_v12  ;;  %v1654_v18 = vld [vmem:[%s1870_s9] sm:$0xff] (!%p401_p10)  ;;  %1262 = vmatprep.mubr.msk.bf16.mxu0 (!%p401_p10), %vm1463_vm4, %v1462_v14  ;;  %1328 = vset.pattern.permute.xlu1 (!%p401_p10), %v1464_v31  ;;  %vm495_vm8 = vcmask (!%p401_p10), 7168   ;;  %vm662_vm13 = vcmask (!%p401_p10), 64512   ;;  %s1233_s27 = sshll.u32 (!%p401_p10), %s1452_s24, 7 }
  0x17   : > { %v559_v15 = vsel (!%p401_p10), %vm552_vm0, %v558_v11, -inf  ;;  %v575_v21 = vsel (!%p401_p10), %vm552_vm0, %v1654_v18, 0.0  ;;  %1329 = vset.pattern.permute.xlu0 (!%p401_p10), %v1465_v37  ;;  %v1466_v11 = vmov (!%p401_p10), 2   ;;  %497 = vst.msk [vmem:[#allocation4] sm:$0xff] (!%p401_p10), %vm495_vm8, %v1462_v14  ;;  %498 = vst.msk [vmem:[#allocation5] sm:$0xff] (!%p401_p10), %vm495_vm8, %v1462_v14 }
  0x18   : > { %v1598_v1 = vld [vmem:[%s1879_s0] sm:$0xff] (!%p401_p10)  ;;  %s1631_s0 = sshll.u32 (!%p401_p10), %s1452_s24, 4  ;;  %560 = vmax.xlane.f32.xlu0 (!%p401_p10), %v559_v15  ;;  %v1467_v15 = vmov (!%p401_p10), 3  }
  0x19   : > { %v483_v4 = vmul.f32 (!%p401_p10), %v1598_v1, %v1598_v1  ;;  %p457_p11 = scmp.lt.s32.totalorder (!%p401_p10), %s1631_s0, 31 }
  0x1b   : > { %v485_v10 = vsel %vm484_vm1, %v483_v4, 0.0  ;;  %s458_s30 = scalar_select %p457_p11, %s1631_s0, 31 }
  0x1c   : > { %486 = vadd.xlane.f32.xlu1 %v485_v10  ;;  %524 = vmax.xlane.f32.xlu0 %v523_v17 }
  0x1d   : > { %s1211_s14 = sshll.u32 %s458_s30, 2  ;;  %s1469_s30 = smov [#allocation6]  }
  0x1e   : > { %s1649_s19 = scalar_lea.vmem %s1880_s1, %s1211_s14 }
  0x1f   : > { %v1340_v19 = vld [vmem:[%s1649_s19] sm:$0xff]   ;;  %v1341_v22 = vld [vmem:[%s1649_s19 + $0x8] sm:$0xff]   ;;  %v1342_v24 = vld [vmem:[%s1649_s19 + $0x10] sm:$0xff]   ;;  %s1739_s14 = scalar_select %p464_p12, %s1452_s24, 1 }
  0x20   : > { %507 = vmax.xlane.f32.xlu1 %v506_v16  ;;  %v941_v20 = vsel %vm484_vm1, %v1340_v19, 0  ;;  %576 = vadd.xlane.f32.xlu0 %v575_v21  ;;  %v944_v23 = vsel %vm484_vm1, %v1341_v22, 0  ;;  %v947_v25 = vsel %vm484_vm1, %v1342_v24, 0  ;;  %v1343_v26 = vld [vmem:[%s1649_s19 + $0x18] sm:$0xff]   ;;  %v1344_v28 = vld [vmem:[%s1649_s19 + $0x20] sm:$0xff]   ;;  %v1345_v30 = vld [vmem:[%s1649_s19 + $0x28] sm:$0xff]  }
  0x21   : > { %1247 = vmatpush3.bf16.xpose.msra.mxu0 %v941_v20  ;;  %v950_v27 = vsel %vm484_vm1, %v1343_v26, 0  ;;  %v953_v29 = vsel %vm484_vm1, %v1344_v28, 0  ;;  %v956_v32 = vsel %vm484_vm1, %v1345_v30, 0  ;;  %v1346_v33 = vld [vmem:[%s1649_s19 + $0x30] sm:$0xff]   ;;  %v1347_v35 = vld [vmem:[%s1649_s19 + $0x38] sm:$0xff]   ;;  %s1212_s17 = sshll.u32 %s1739_s14, 1 }
  0x22   : > { %1248 = vmatprep.subr.bf16.mxu0 %v1462_v14  ;;  %v959_v34 = vsel %vm484_vm1, %v1346_v33, 0  ;;  %v962_v36 = vsel %vm484_vm1, %v1347_v35, 0  ;;  %s467_s20 = scalar_lea.vmem %s1881_s2, %s1212_s17  ;;  %s1213_s24 = sshll.u32 %s1739_s14, 3 }
  0x23   : > { %v1223_v33 = vld [vmem:[%s467_s20 + $0x1] ss:$0 sm:$0xff]  ;;  %s472_s19 = scalar_lea.vmem %s1871_s10, %s1213_s24  ;;  %s453_s20 = sand.u32 1, %s1444_s22  }
  0x24   : > { %s476_s18 = scalar_lea.vmem %s1872_s11, %s1213_s24  ;;  %s1813_s2 = scalar_lea.hbm %s1873_s12, %s1631_s0 }
  0x25   : > { %s1064_s14 = scalar_lea.sflag [#allocation7], %s453_s20  ;;  %s1386_s17 = sshll.u32 %s1469_s30, 4  ;;  %s1387_s17 = int_to_ptr.vmem [resolvable:$false] %s1386_s17 }
  0x26   : > { %s1388_s0 = scalar_lea.vmem %s1387_s17, 32 }
  0x29   : > { %1249 = vmatpush3.bf16.xpose.msra.mxu0 %v944_v23 }
  0x2a   : > { %1250 = vmatprep.subr.bf16.mxu0 %v1462_v14 }
  0x31   : > { %1251 = vmatpush3.bf16.xpose.msra.mxu0 %v947_v25 }
  0x32   : > { %1252 = vmatprep.subr.bf16.mxu0 %v1462_v14 }
  0x39   : > { %1253 = vmatpush3.bf16.xpose.msra.mxu0 %v950_v27 }
  0x3a   : > { %1254 = vmatprep.subr.bf16.mxu0 %v1462_v14 }
  0x41   : > { %1255 = vmatpush3.bf16.xpose.msra.mxu0 %v953_v29 }
  0x42   : > { %1256 = vmatprep.subr.bf16.mxu0 %v1462_v14 }
  0x49   : > { %1257 = vmatpush3.bf16.xpose.msra.mxu0 %v956_v32  ;;  %v1468_v32 = vmov -1e+30  }
  0x4a   : > { %1258 = vmatprep.subr.bf16.mxu0 %v1462_v14  ;;  %496 = vst.msk [vmem:[#allocation3] sm:$0xff] %vm495_vm8, %v1468_v32 }
  0x51   : > { %1259 = vmatpush3.bf16.xpose.msra.mxu0 %v959_v34 }
  0x52   : > { %1260 = vmatprep.subr.bf16.mxu0 %v1462_v14 }
  0x59   : > { %1261 = vmatpush3.bf16.xpose.msra.mxu0 %v962_v36 }
  0xa1   : > { %v1684_v38 = vpop.xlane.xlu0 %554 }
  0xa2   : > { %vm556_vm5 = vcmp.gt.f32.partialorder %v1684_v38, 0.0 }
  0xa5   : > { %v561_v41 = vpop.xlane.xlu0 %560 }
  0xa6   : > { %v562_v42 = vsel %vm556_vm5, %v561_v41, 0.0 }
  0xa7   : > { %v563_v43 = vsub.f32 %v1607_v5, %v562_v42 }
  0xa9   : > { %v487_v39 = vpop.xlane.xlu1 %486  ;;  %v564_v47 = vmul.f32 1.442695, %v563_v43  ;;  %v525_v48 = vpop.xlane.xlu0 %524 }
  0xaa   : > { %v488_v40 = vmax.f32 %v487_v39, 1e-24  ;;  %v1697_v49 = vsub.f32 %v1623_v8, %v525_v48  ;;  %v1700_v50 = vsub.f32 %v1613_v6, %v525_v48 }
  0xac   : > { %1348 = vrsqrt.f32 %v488_v40  ;;  %v528_v53 = vmul.f32 1.442695, %v1697_v49  ;;  %v530_v54 = vmul.f32 1.442695, %v1700_v50 }
  0xad   : > { %v508_v44 = vpop.xlane.xlu1 %507  ;;  %1350 = vpow2.f32 %v564_v47  ;;  %v577_v8 = vpop.xlane.xlu0 %576 }
  0xae   : > { %v1691_v45 = vsub.f32 %v1618_v7, %v508_v44  ;;  %v1694_v46 = vsub.f32 %v1628_v9, %v508_v44  ;;  %v551_v9 = vld [vmem:[%s1867_s6] sm:$0xff]  ;;  %vm578_vm7 = vcmp.gt.f32.partialorder %v577_v8, 0.0  ;;  %v584_v44 = vlaneseq }
  0xb0   : > { %v511_v51 = vmul.f32 1.442695, %v1691_v45  ;;  %v513_v52 = vmul.f32 1.442695, %v1694_v46  ;;  %v1748_v48 = vand.u32 127, %v584_v44 }
  0xb2   : > { %1352 = vpow2.f32 %v511_v51  ;;  %vm869_vm4 = vcmp.eq.s32.totalorder %v1748_v48, 0 }
  0xb3   : > { %1354 = vpow2.f32 %v513_v52 }
  0xb4   : > { %1356 = vpow2.f32 %v528_v53 }
  0xb5   : > { %1358 = vpow2.f32 %v530_v54 }
  0xb6   : > { %v1349_v55 = vpop.eup %1348 }
  0xb7   : > { %v490_v56 = vmul.f32 20.0, %v1349_v55  ;;  %v1351_v58 = vpop.eup %1350 }
  0xb8   : > { %v566_v61 = vmul.f32 %v1351_v58, %v1593_v0  ;;  %v579_v0 = vmax.f32 %v577_v8, 1e-30 }
  0xb9   : > { %v491_v57 = vmul.f32 %v490_v56, %v1598_v1 }
  0xba   : > { %v567_v2 = vsel %vm552_vm0, %v566_v61, 0.0  ;;  %1360 = vrcp.f32 %v579_v0 }
  0xbb   : > { %v492_v59 = vpack.c.bf16 %v491_v57, %v491_v57  ;;  %568 = vadd.xlane.f32.xlu1 %v567_v2 }
  0xbc   : > { %v1353_v60 = vpop.eup %1352 }
  0xbd   : > { %v1355_v62 = vpop.eup %1354  ;;  %494 = vst.msk [vmem:[#allocation2] sm:$0xf] %vm493_vm6, %v492_v59 }
  0xbe   : > { %v1357_v63 = vpop.eup %1356  ;;  %v515_v3 = vsel %vm504_vm2, %v1355_v62, 0.0 }
  0xbf   : > { %v1359_v4 = vpop.eup %1358  ;;  %v516_v5 = vadd.f32 %v1353_v60, %v515_v3 }
  0xc0   : > { %v532_v6 = vsel %vm504_vm2, %v1359_v4, 0.0 }
  0xc1   : > { %v533_v7 = vadd.f32 %v1357_v63, %v532_v6  ;;  %517 = vadd.xlane.f32.xlu1 %v516_v5 }
  0xc3   : > { %534 = vadd.xlane.f32.xlu0 %v533_v7 }
  0xc4   : > { %v890_v1 = vld [vmem:[#allocation2] sm:$0xf]  ;;  %v1361_v10 = vpop.eup %1360 }
  0xc5   : > { %1263 = vmatmul.mubr.msk.bf16.vlgmr.msra.gmra.mrb[0].mxu0 %vm484_vm1, %v890_v1  ;;  %v582_v12 = vsel %vm578_vm7, %v1361_v10, 0.0 }
  0xc6   : > { %v583_v13 = vmul.f32 %v582_v12, %v1654_v18 }
  0xd2   : > { %587 = vperm.xlu1 %1328, %v551_v9  }
  0xd6   : > { %1330 = vset.pattern.permute.xlu1 %v1466_v11 }
  0xd7   : > { %625 = vperm.xlu1 %1330, %v551_v9  }
  0xd9   : > { %607 = vperm.xlu0 %1329, %v551_v9  }
  0xdb   : > { %1331 = vset.pattern.permute.xlu1 %v1467_v15 }
  0xdc   : > { %643 = vperm.xlu1 %1331, %v551_v9  }
  0xdd   : > { %1334 = vset.pattern.permute.xlu0 %v1466_v11 }
  0xde   : > { %637 = vperm.xlu0 %1334, %v583_v13  }
  0xe0   : > { %1332 = vset.pattern.permute.xlu1 %v1464_v31 }
  0xe1   : > { %601 = vperm.xlu1 %1332, %v583_v13  }
  0xe2   : > { %1339 = vset.pattern.permute.xlu0 %v1464_v31 }
  0xe5   : > { %1333 = vset.pattern.permute.xlu1 %v1465_v37 }
  0xe6   : > { %619 = vperm.xlu1 %1333, %v583_v13  }
  0xea   : > { %1335 = vset.pattern.permute.xlu1 %v1464_v31 }
 0x148   : > { %v569_v16 = vpop.xlane.xlu1 %568 }
 0x149   : > { %v570_v17 = vmax.f32 %v569_v16, 1e-30  ;;  %v503_v16 = vld [vmem:[%s1864_s3] sm:$0xff] }
 0x14b   : > { %1362 = vrcp.f32 %v570_v17  ;;  %v1032_v17 = vstv %s1233_s27  ;;  %s454_s27 = scalar_lea.vmem [#allocation6], %s453_s20 }
 0x14c   : > { %s1082_s28 = sshll.u32 %s454_s27, 4  ;;  %s1815_s28 = int_to_ptr.vmem [resolvable:$true] %s1082_s28 }
 0x14d   : > { %s1382_s24 = scalar_lea.vmem %s1815_s28, 16  ;;  %p1389_p2 = scmp.lt.s32.totalorder %s1815_s28, %s1387_s17 }
 0x14e   : > { %v1722_v18 = vpop.xlane.xlu1 %517  ;;  %p1383_p13 = scmp.ne.s32.totalorder %s1815_s28, %s1382_s24  ;;  %p1390_p3 = scmp.lt.s32.totalorder %s1388_s0, %s1382_s24 }
 0x150   : > { %v1720_v19 = vpop.xlane.xlu0 %534  ;;  %p1384_p0 = pnand %p1383_p13, %p1575_p4  ;;  %p1391_p5 = por %p1390_p3, %p1389_p2 }
 0x151   : > { %1364 = vrcp.f32 %v1720_v19 }
 0x152   : > { %1366 = vrcp.f32 %v1722_v18  ;;  %v588_v39 = vpop.permute.xlu1 %587  ;;  %p1385_p1 = pneg %p1384_p0 }
 0x153   : > { %vm589_vm9 = vcmp.eq.s32.totalorder %v1748_v48, %v588_v39 }
 0x154   : > { %v1215_v53 = vsel %vm589_vm9, 1.0, %v1462_v14  ;;  %p1392_p6 = pnand %p1391_p5, %p1385_p1 }
 0x155   : > { %v1363_v20 = vpop.eup %1362 }
 0x156   : > { %v572_v21 = vmul.f32 0.5, %v1363_v20  ;;  %v626_v40 = vpop.permute.xlu1 %625  ;;  %v1033_v20 = vsub.s32 %v503_v16, %v1032_v17 }
 0x157   : > { %vm627_vm11 = vcmp.eq.s32.totalorder %v1748_v48, %v626_v40 }
 0x158   : > { %v573_v23 = vsel %vm556_vm5, %v572_v21, 0.0  ;;  %v608_v51 = vpop.permute.xlu0 %607  ;;  %v1217_v57 = vsel %vm627_vm11, 1.0, %v1462_v14 }
 0x159   : > { %v574_v27 = vmul.f32 %v573_v23, %v566_v61  ;;  %vm609_vm10 = vcmp.eq.s32.totalorder %v1748_v48, %v608_v51 }
 0x15a   : > { %v1216_v54 = vsel %vm609_vm10, 1.0, %v1462_v14 }
 0x15b   : > { %v1365_v22 = vpop.eup %1364  ;;  %594 = vperm.xlu1 %1335, %v574_v27   ;;  %v644_v41 = vpop.permute.xlu1 %643 }
 0x15c   : > { %v538_v24 = vmul.f32 %v1365_v22, %v1359_v4  ;;  %v537_v25 = vmul.f32 %v1365_v22, %v1357_v63  ;;  %v1367_v26 = vpop.eup %1366  ;;  %vm645_vm12 = vcmp.eq.s32.totalorder %v1748_v48, %v644_v41 }
 0x15d   : > { %v521_v28 = vmul.f32 %v1367_v26, %v1355_v62  ;;  %v1728_v29 = vmul.f32 %v1367_v26, %v1353_v60  ;;  %v638_v62 = vpop.permute.xlu0 %637  ;;  %v1218_v2 = vsel %vm645_vm12, 1.0, %v1462_v14 }
 0x15e   : > { %v640_v5 = vmul.f32 %v1217_v57, %v638_v62 }
 0x15f   : > { %v661_v30 = vadd.f32 %v538_v24, %v521_v28  ;;  %v660_v31 = vadd.f32 %v537_v25, %v1728_v29  ;;  %1336 = vset.pattern.permute.xlu1 %v1465_v37  ;;  %v811_v25 = vadd.s32 128, %v1748_v48 }
 0x160   : > { %613 = vperm.xlu1 %1336, %v574_v27   ;;  %v602_v42 = vpop.permute.xlu1 %601 }
 0x161   : > { %666 = vmatprep.subr.mxu1 %v661_v30  ;;  %v604_v58 = vmul.f32 %v1215_v53, %v602_v42 }
 0x162   : > { %667 = vmatpush1.msra.mxu1 %v660_v31 }
 0x163   : > { %740 = vmatprep.subr.mxu1 %v521_v28 }
 0x164   : > { %1337 = vset.pattern.permute.xlu1 %v1466_v11  ;;  %v1760_v11 = vld [vmem:[#allocation3] sm:$0xff] }
 0x165   : > { %631 = vperm.xlu1 %1337, %v574_v27   ;;  %v620_v43 = vpop.permute.xlu1 %619 }
 0x166   : > { %v622_v59 = vmul.f32 %v1216_v54, %v620_v43 }
 0x168   : > { %v623_v4 = vadd.f32 %v622_v59, %v604_v58 }
 0x169   : > { %1338 = vset.pattern.permute.xlu1 %v1467_v15 }
 0x16a   : > { %649 = vperm.xlu1 %1338, %v574_v27   ;;  %v641_v0 = vadd.f32 %v640_v5, %v623_v4 }
 0x16e   : > { %655 = vperm.xlu1 %1338, %v583_v13  }
 0x198   : > { %v998_v34 = vpop.f32.mrb[0].mxu0 }
 0x199   : > { %v1745_v35 = vadd.f32 %v1223_v33, %v998_v34  ;;  %v1264_v36 = vpop.f32.mrb[1].mxu0 }
 0x19a   : > { %v1001_v37 = vpop.f32.mrb[2].mxu0 }
 0x19b   : > { %1005 = vmax.xlane.f32.xlu1 %v1745_v35  ;;  %v1265_v38 = vpop.f32.mrb[3].mxu0 }
 0x1da   : > { %v595_v47 = vpop.permute.xlu1 %594 }
 0x1db   : > { %v597_v60 = vmul.f32 %v1215_v53, %v595_v47 }
 0x1df   : > { %v614_v52 = vpop.permute.xlu1 %613 }
 0x1e0   : > { %v616_v55 = vmul.f32 %v1216_v54, %v614_v52 }
 0x1e2   : > { %v617_v63 = vadd.f32 %v616_v55, %v597_v60 }
 0x1e4   : > { %v632_v56 = vpop.permute.xlu1 %631 }
 0x1e5   : > { %v634_v61 = vmul.f32 %v1217_v57, %v632_v56 }
 0x1e7   : > { %v635_v6 = vadd.f32 %v634_v61, %v617_v63 }
 0x1e9   : > { %v650_v3 = vpop.permute.xlu1 %649 }
 0x1ea   : > { %v652_v7 = vmul.f32 %v1218_v2, %v650_v3 }
 0x1ec   : > { %v653_v1 = vadd.f32 %v652_v7, %v635_v6 }
 0x1ed   : > { %v656_v8 = vpop.permute.xlu1 %655 }
 0x1ee   : > { %v658_v9 = vmul.f32 %v1218_v2, %v656_v8  ;;  %1219 = vmatmul.mubr.msk.f32.vlgmr.msra.gmra.mrb[0].mxu1 %vm662_vm13, %v653_v1 }
 0x1ef   : > { %741 = vmatpush1.msra.mxu1 %v1728_v29  ;;  %804 = vmatprep.mubr.f32.mxu1 %v1462_v14 }
 0x1f0   : > { %v659_v10 = vadd.f32 %v658_v9, %v641_v0  ;;  %v1008_v0 = vld [vmem:[#allocation4] sm:$0xff] }
 0x1f2   : > { %1220 = vmatmul.mubr.msk.f32.vlgmr.msra.gmra.mrb[2].mxu1 %vm662_vm13, %v659_v10 }
 0x228   : > { %v1006_v12 = vpop.xlane.xlu1 %1005 }
 0x229   : > { %v1763_v13 = vmax.f32 %v1760_v11, %v1006_v12 }
 0x22b   : > { %v1009_v15 = vsub.f32 %v1760_v11, %v1763_v13  ;;  %1026 = vst.msk [vmem:[#allocation3] sm:$0xff] %vm495_vm8, %v1763_v13  ;;  %1015 = vperm.xlu0 %1339, %v1763_v13  }
 0x22d   : > { %v1010_v1 = vmul.f32 1.442695, %v1009_v15 }
 0x22f   : > { %813 = vperm.xlu0 %1339, %v503_v16  }
 0x233   : > { %1036 = vperm.xlu0 %1339, %v1033_v20  }
 0x2aa   : > { %v1016_v21 = vpop.permute.xlu0 %1015 }
 0x2ab   : > { %v1018_v22 = vsub.f32 %v1745_v35, %v1016_v21 }
 0x2ad   : > { %v1019_v23 = vmul.f32 1.442695, %v1018_v22 }
 0x2ae   : > { %v814_v26 = vpop.permute.xlu0 %813 }
 0x2af   : > { %1368 = vpow2.f32 %v1019_v23  ;;  %vm815_vm14 = vcmp.eq.s32.totalorder %v1748_v48, %v814_v26  ;;  %vm816_vm15 = vcmp.eq.s32.totalorder %v811_v25, %v814_v26  ;;  %v1034_v25 = vld [vmem:[#allocation5] sm:$0xff] }
 0x2b0   : > { %1370 = vlog2.f32 %v1720_v19  ;;  %v1221_v28 = vsel %vm815_vm14, 1.0, %v1462_v14  ;;  %v1222_v29 = vsel %vm816_vm15, 1.0, %v1462_v14 }
 0x2b1   : > { %1372 = vlog2.f32 %v1722_v18  ;;  %v821_v32 = vmul.f32 0.7, %v1221_v28  ;;  %v822_v33 = vmul.f32 0.7, %v1222_v29 }
 0x2b2   : > { %v1037_v6 = vpop.permute.xlu0 %1036 }
 0x2b3   : > { %vm1038_vm3 = vcmp.eq.s32.totalorder %v1748_v48, %v1037_v6 }
 0x2b4   : > { %v1039_v7 = vsel %vm1038_vm3, %v1745_v35, 0.0  ;;  %v1047_v35 = vld [vmem:[#allocation3] sm:$0xff] }
 0x2b9   : > { %v1369_v24 = vpop.eup %1368 }
 0x2ba   : > { %1021 = vadd.xlane.f32.xlu0 %v1369_v24  ;;  %v1371_v27 = vpop.eup %1370 }
 0x2bb   : > { %v1373_v30 = vpop.eup %1372  ;;  %v544_v31 = vmul.f32 0.6931472, %v1371_v27 }
 0x2bc   : > { %v540_v34 = vmul.f32 0.6931472, %v1373_v30 }
 0x2bd   : > { %v545_v38 = vsub.f32 %v1697_v49, %v544_v31  ;;  %v546_v42 = vsub.f32 %v1700_v50, %v544_v31 }
 0x2be   : > { %v541_v51 = vsub.f32 %v1691_v45, %v540_v34  ;;  %v542_v55 = vsub.f32 %v1694_v46, %v540_v34 }
 0x2c1   : > { %v732_v19 = vpop.f32.mrb[0].mxu1 }
 0x2c2   : > { %v823_v36 = vmul.f32 0.3, %v732_v19  ;;  %v734_v18 = vpop.f32.mrb[1].mxu1 }
 0x2c3   : > { %v824_v37 = vmul.f32 0.3, %v734_v18 }
 0x2c4   : > { %v825_v39 = vadd.f32 %v823_v36, %v821_v32 }
 0x2c5   : > { %v826_v40 = vadd.f32 %v824_v37, %v822_v33  ;;  %v806_v41 = vpop.f32.mrb[2].mxu1 }
 0x2c6   : > { %v827_v43 = vsub.f32 0.0, %v825_v39  ;;  %v844_v44 = vmax.f32 %v806_v41, 1e-30  ;;  %v808_v47 = vpop.f32.mrb[3].mxu1  ;;  %v854_v14 = vmul.f32 %v806_v41, %v545_v38  ;;  %vm842_vm0 = vcmp.gt.f32.partialorder %v806_v41, 0.0 }
 0x2c7   : > { %v828_v52 = vsub.f32 0.0, %v826_v40  ;;  %v845_v53 = vmax.f32 %v808_v47, 1e-30  ;;  %v855_v54 = vmul.f32 %v808_v47, %v546_v42  ;;  %vm843_vm1 = vcmp.gt.f32.partialorder %v808_v47, 0.0 }
 0x2c8   : > { %1374 = vlog2.f32 %v844_v44  ;;  %v829_v56 = vmul.f32 %v827_v43, %v541_v51 }
 0x2c9   : > { %1376 = vlog2.f32 %v845_v53  ;;  %v830_v49 = vmul.f32 %v828_v52, %v542_v55 }
 0x2ca   : > { %1378 = vpow2.f32 %v1010_v1 }
 0x2cb   : > { %v831_v57 = vsel %vm504_vm2, %v830_v49, 0.0 }
 0x2cc   : > { %v832_v58 = vadd.f32 %v831_v57, %v829_v56 }
 0x2d2   : > { %v1375_v59 = vpop.eup %1374 }
 0x2d3   : > { %v1377_v50 = vpop.eup %1376  ;;  %v847_v60 = vmul.f32 0.6931472, %v1375_v59 }
 0x2d4   : > { %v849_v61 = vmul.f32 0.6931472, %v1377_v50  ;;  %v1379_v8 = vpop.eup %1378 }
 0x2d5   : > { %v850_v62 = vmul.f32 %v847_v60, %v806_v41  ;;  %v1012_v9 = vmul.f32 %v1379_v8, %v1008_v0 }
 0x2d6   : > { %v851_v63 = vmul.f32 %v849_v61, %v808_v47 }
 0x2d7   : > { %v852_v45 = vsel %vm842_vm0, %v850_v62, 0.0 }
 0x2d8   : > { %v853_v2 = vsel %vm843_vm1, %v851_v63, 0.0  ;;  %v856_v3 = vsub.f32 %v852_v45, %v854_v14 }
 0x2d9   : > { %v857_v4 = vsub.f32 %v853_v2, %v855_v54 }
 0x2db   : > { %v858_v46 = vsel %vm504_vm2, %v857_v4, 0.0  ;;  %vm870_vm2 = vcmp.eq.s32.totalorder %v1748_v48, 1 }
 0x2dc   : > { %v859_v5 = vadd.f32 %v858_v46, %v856_v3 }
 0x2de   : > { %860 = vadd.xlane.f32.xlu1 %v859_v5 }
 0x2e2   : > { %833 = vadd.xlane.f32.xlu1 %v832_v58 }
 0x2e6   : > { %1040 = vadd.xlane.f32.xlu1 %v1039_v7 }
 0x347   : > { %v1022_v10 = vpop.xlane.xlu0 %1021 }
 0x348   : > { %v1023_v12 = vadd.f32 %v1022_v10, %v1012_v9 }
 0x34a   : > { %1025 = vst.msk [vmem:[#allocation4] sm:$0xff] %vm495_vm8, %v1023_v12 }
 0x351   : > { %v1048_v16 = vld [vmem:[#allocation4] sm:$0xff] }
 0x352   : > { %1380 = vlog2.f32 %v1048_v16 }
 0x35c   : > { %v1381_v17 = vpop.eup %1380 }
 0x35d   : > { %v1050_v20 = vmul.f32 0.6931472, %v1381_v17 }
 0x35f   : > { %v1051_v11 = vadd.f32 %v1050_v20, %v1047_v35 }
 0x361   : > { %1052 = vst.msk [vmem:[%s472_s19] sm:$0xff] %vm495_vm8, %v1051_v11 }
 0x36b   : > { %v861_v13 = vpop.xlane.xlu1 %860 }
 0x36c   : > { %v862_v15 = vrot.slane %v861_v13, 4 }
 0x36e   : > { %v863_v21 = vadd.f32 %v862_v15, %v861_v13 }
 0x36f   : > { %v834_v22 = vpop.xlane.xlu1 %833 }
 0x370   : > { %v864_v23 = vrot.slane %v863_v21, 2  ;;  %v835_v24 = vrot.slane %v834_v22, 4 }
 0x372   : > { %v865_v26 = vadd.f32 %v864_v23, %v863_v21  ;;  %v836_v27 = vadd.f32 %v835_v24, %v834_v22 }
 0x373   : > { %v1041_v28 = vpop.xlane.xlu1 %1040 }
 0x374   : > { %v866_v29 = vrot.slane %v865_v26, 1  ;;  %v837_v30 = vrot.slane %v836_v27, 2  ;;  %v1042_v31 = vadd.f32 %v1041_v28, %v1034_v25 }
 0x376   : > { %v867_v32 = vadd.f32 %v866_v29, %v865_v26  ;;  %v838_v33 = vadd.f32 %v837_v30, %v836_v27  ;;  %1043 = vst.msk [vmem:[#allocation5] sm:$0xff] %vm495_vm8, %v1042_v31 }
 0x378   : > { %v839_v19 = vrot.slane %v838_v33, 1  ;;  %v868_v34 = vmul.f32 0.125, %v867_v32 }
 0x37a   : > { %v840_v36 = vadd.f32 %v839_v19, %v838_v33  ;;  %v871_v38 = vsel %vm870_vm2, %v868_v34, 0.0 }
 0x37c   : > { %v841_v18 = vmul.f32 0.125, %v840_v36 }
 0x37d   : > { %v1053_v37 = vld [vmem:[#allocation5] sm:$0xff] }
 0x37e   : > { %1054 = vst.msk [vmem:[%s476_s18] sm:$0xff] %vm495_vm8, %v1053_v37  ;;  %v872_v39 = vsel %vm869_vm4, %v841_v18, %v871_v38 }
 0x37f   : > { %873 = vst [vmem:[%s454_s27] sm:$0x1] %v872_v39 }
 0x380   : > { %1395 = shalt.err (!%p1392_p6)
}
 0x381   : > { %s1396_s1 = scalar_lea.hbm %s1813_s2, 16  ;;  %s1400_s18 = scalar_lea.hbm %s1873_s12, 32 }
 0x382   : > { %p1397_p7 = scmp.ne.s32.totalorder %s1813_s2, %s1396_s1  ;;  %p1401_p11 = scmp.lt.u32.totalorder %s1813_s2, %s1873_s12 }
 0x383   : > { %p1402_p12 = scmp.lt.u32.totalorder %s1400_s18, %s1396_s1  ;;  %p1404_p0 = scmp.lt.u32.totalorder %s1396_s1, %s1813_s2 }
 0x384   : > { %p1398_p9 = pnand %p1397_p7, %p1575_p4 }
 0x385   : > { %p1403_p13 = por %p1402_p12, %p1401_p11 }
 0x386   : > { %p1399_p10 = pneg %p1398_p9 }
 0x387   : > { %p1405_p1 = por %p1404_p0, %p1403_p13 }
 0x389   : > { %p1406_p2 = pnand %p1405_p1, %p1399_p10 }
 0x38b   : > { %1409 = shalt.err (!%p1406_p2)
}
 0x38c   : > { %1266 = dma.vmem_to_hbm [thread:$0]  (%p1575_p4), %s1815_s28, 16, %s1813_s2, %s1064_s14  }
 0x38d PF: > { %p1272_p3 = scmp.ge.s32.totalorder %s1460_s26, 2  ;;  %s1108_s24 = sand.u32 1, %s1440_s21  }
 0x38e   : > { %s1109_s17 = scalar_lea.sflag [#allocation7], %s1108_s24 }
 0x38f   : > { %p1269_p5 = pnand %p1272_p3, %p1582_p8 }
 0x391   : > { %1435 = dma.done.wait (!%p1269_p5), %s1109_s17, 16  }
 0x392   : > { %1437 = vsyncadd (!%p1269_p5), %s1109_s17, 4294967280  ;;  %s26_s26 = sadd.s32 1, %s1460_s26   ;;  %s1882_s21 = smov %s1444_s22 }
 0x393   : > { %p23_p6 = scmp.ge.s32.totalorder %s26_s26, 4   ;;  %s1883_s22 = smov %s1448_s23 }
 0x394   : > { %s1884_s23 = smov %s1588_s16  ;;  %s1885_s24 = smov %s1456_s25 }
 0x395   : > { %s1886_s25 = smov %s1888_s29  ;;  %25 = sbr.rel (!%p23_p6) target bundleno = 8 (0x8), region = 130 }
 0x39c   :  { %1113 = vsyncpa [#allocation7], 1 }
 0x39d   :  { %1115 = vsyncpa [#allocation7 + $0x1], 1 }

</bundles_post_ra>
